<compile_context>
chip_gen: v6e
topology: v6e:2x2x1
jax: 0.10.0
libtpu: 0.0.40
codegen_flags: <defaults>
</compile_context>

<pallas_src>
import functools

import jax
import jax.numpy as jnp
from jax.experimental import pallas as pl
from jax.experimental.pallas import tpu as pltpu


def _round_up(x, m):
    return ((x + m - 1) // m) * m


def _pick_tile_m(m):
    """Adaptive M tile: a single tile for small problems, otherwise tiles of up to
    512 rows chosen so the grid has at least 2 steps (v7x has 2 TensorCores)."""
    mr = _round_up(m, 8)
    if mr <= 256:
        return mr
    tm = 512
    while tm > 128 and pl.cdiv(mr, tm) < 2:
        tm //= 2
    return tm


# ----------------------------------------------------------------------------
# Pallas kernel
# ----------------------------------------------------------------------------
def _vq_kernel(x_ref, et_ref, e_ref, e2_ref, q_ref, loss_ref, *, m_true, tile_m):
    """One M-tile of nearest-codebook quantization + fused VQ-loss partial.

    x_ref   : (TM, D)       f32   flattened latents tile
    et_ref  : (D, Ncode_p)  bf16  codebook, pre-transposed (distance cross-term)
    e_ref   : (Ncode_p, D)  f32   codebook (exact one-hot gather)
    e2_ref  : (1, Ncode_p)  f32   ||e||^2 per code (padded codes = +huge sentinel)
    q_ref   : (TM, D)       f32   quantized tile
    loss_ref: (1, 128)      f32   per-tile sum((q - x)^2) in lane 0, zeros elsewhere
    """
    i = pl.program_id(0)
    x = x_ref[...]

    # ||x||^2 is constant per row -> does not affect the argmin, so the distance
    # reduces to ||e||^2 - 2 x.e.  Cross-term on the MXU in bf16, f32 accumulation.
    xe = jnp.dot(x.astype(jnp.bfloat16), et_ref[...],
                 preferred_element_type=jnp.float32)             # (TM, Ncode_p)
    dist = e2_ref[...] - 2.0 * xe                                # (TM, Ncode_p)

    ncode_p = dist.shape[1]
    dmin = jnp.min(dist, axis=1, keepdims=True)                  # (TM, 1)
    code_iota = jax.lax.broadcasted_iota(jnp.int32, dist.shape, 1)
    cand = jnp.where(dist == dmin, code_iota, ncode_p)
    idx = jnp.min(cand, axis=1, keepdims=True)                   # first argmin index
    onehot = (code_iota == idx).astype(jnp.float32)              # (TM, Ncode_p)

    # Exact f32 gather of the selected codebook rows (padded codes never selected).
    q = jnp.dot(onehot, e_ref[...], preferred_element_type=jnp.float32)
    q_ref[...] = q

    # Fused VQ loss: masked per-tile sum of squared differences.  Rows beyond the
    # true M (zero padding of the last tile) are excluded.
    row = i * tile_m + jax.lax.broadcasted_iota(jnp.int32, (tile_m, 1), 0)
    valid = (row < m_true).astype(jnp.float32)                   # (TM, 1)
    diff = q - x
    ssd = jnp.sum(diff * diff * valid)                           # scalar
    lane = jax.lax.broadcasted_iota(jnp.int32, (1, 128), 1)
    loss_ref[...] = jnp.where(lane == 0, ssd, 0.0)


# ----------------------------------------------------------------------------
# Wrapper
# ----------------------------------------------------------------------------
def vector_quantize(flat_x, embeddings, commitment_cost):
    """flat_x (M, D) f32, embeddings (Ncode, D) f32 -> (quantized (M, D), loss)."""
    m, d = flat_x.shape
    ncode = embeddings.shape[0]
    ncode_p = _round_up(ncode, 128)          # lane-dense codebook axis
    tile_m = _pick_tile_m(m)
    m_pad = _round_up(m, tile_m)
    grid_m = m_pad // tile_m

    x_p = flat_x if m_pad == m else jnp.pad(flat_x, ((0, m_pad - m), (0, 0)))

    # Codebook layouts prepared once in the wrapper (layout plumbing stays out of
    # the hot loop): padded f32 copy for the gather, bf16 pre-transposed copy for
    # the MXU cross-term, squared norms with a sentinel for padded codes.
    e_p = jnp.pad(embeddings.astype(jnp.float32),
                  ((0, ncode_p - ncode), (0, 0)))                 # (Ncode_p, D) f32
    e_t = jnp.transpose(e_p).astype(jnp.bfloat16)                 # (D, Ncode_p) bf16
    e2 = jnp.sum(e_p * e_p, axis=1)
    e2 = jnp.where(jnp.arange(ncode_p) < ncode, e2,
                   jnp.float32(1e30)).reshape(1, ncode_p)         # (1, Ncode_p) f32

    q_pad, loss_parts = pl.pallas_call(
        functools.partial(_vq_kernel, m_true=m, tile_m=tile_m),
        grid=(grid_m,),
        in_specs=[
            pl.BlockSpec((tile_m, d), lambda i: (i, 0)),          # x tile
            pl.BlockSpec((d, ncode_p), lambda i: (0, 0)),         # codebook^T (pinned)
            pl.BlockSpec((ncode_p, d), lambda i: (0, 0)),         # codebook (pinned)
            pl.BlockSpec((1, ncode_p), lambda i: (0, 0)),         # ||e||^2 (pinned)
        ],
        out_specs=(
            pl.BlockSpec((tile_m, d), lambda i: (i, 0)),          # quantized tile
            pl.BlockSpec((1, 128), lambda i: (0, i)),             # per-tile loss partial
        ),
        out_shape=(
            jax.ShapeDtypeStruct((m_pad, d), jnp.float32),
            jax.ShapeDtypeStruct((1, grid_m * 128), jnp.float32),
        ),
        compiler_params=pltpu.CompilerParams(
            dimension_semantics=("parallel",),
        ),
    )(x_p, e_t, e_p, e2)

    ssd_total = jnp.sum(loss_parts)                               # only lane 0 per tile nonzero
    mse = ssd_total / jnp.float32(m * d)
    # q_latent_loss + beta * e_latent_loss: both equal MSE(q, x) in the forward pass.
    loss = (1.0 + commitment_cost) * mse
    return q_pad[:m], loss


def vector_quantizer_forward(x_nchw, embeddings, commitment_cost):
    """Training-mode forward of the PyTorch VectorQuantizer: returns (quantized_nchw, loss)."""
    n, c, h, w = x_nchw.shape
    x_nhwc = jnp.transpose(x_nchw, (0, 2, 3, 1))                  # permute(0,2,3,1)
    flat_x = x_nhwc.reshape(-1, c)
    q_flat, loss = vector_quantize(flat_x, embeddings, commitment_cost)
    quantized = q_flat.reshape(n, h, w, c)
    # Straight-through estimator: forward value x + (q - x) == q.
    # TODO(synk): a custom VJP would be needed for exact PyTorch gradient semantics.
    quantized = x_nhwc + jax.lax.stop_gradient(quantized - x_nhwc)
    quantized_nchw = jnp.transpose(quantized, (0, 3, 1, 2))       # permute(0,3,1,2)
    return quantized_nchw, loss


# ----------------------------------------------------------------------------
# Demo / smoke test
# ----------------------------------------------------------------------------
if __name__ == "__main__":
    embedding_dim = 4
    num_embeddings = 32
    commitment_cost = 0.25

    key = jax.random.PRNGKey(0)
    kx, ke = jax.random.split(key)
    x = jax.random.normal(kx, (2, embedding_dim, 16, 16), jnp.float32)    # NCHW
    emb = jax.random.normal(ke, (num_embeddings, embedding_dim), jnp.float32)

    fwd = jax.jit(functools.partial(vector_quantizer_forward,
                                    commitment_cost=commitment_cost))
    quantized, loss = fwd(x, emb)
    jax.block_until_ready((quantized, loss))

    assert quantized.shape == x.shape
    assert loss.shape == () and bool(jnp.isfinite(loss))

    # Sanity: every quantized vector must be (numerically) one of the codebook rows.
    qf = jnp.transpose(quantized, (0, 2, 3, 1)).reshape(-1, embedding_dim)
    nearest = jnp.min(jnp.sum((qf[:, None, :] - emb[None, :, :]) ** 2, axis=-1), axis=-1)
    assert bool(jnp.max(nearest) < 1e-3)

    # Sanity: fused in-kernel loss matches (1+beta)*MSE(quantized, x) recomputed in XLA.
    ref_loss = (1.0 + commitment_cost) * jnp.mean((quantized - x) ** 2)
    assert bool(jnp.abs(loss - ref_loss) <= 1e-4 * (1.0 + jnp.abs(ref_loss)))

    print("KERNEL_OK")
</pallas_src>

<mosaic_0001>
module attributes {stable_mosaic.version = 11 : i64} {
  func.func @_vq_kernel(%arg0: i32, %arg1: memref<256x4xf32, #tpu.memory_space<vmem>>, %arg2: memref<4x128xbf16, #tpu.memory_space<vmem>>, %arg3: memref<128x4xf32, #tpu.memory_space<vmem>>, %arg4: memref<1x128xf32, #tpu.memory_space<vmem>>, %arg5: memref<256x4xf32, #tpu.memory_space<vmem>>, %arg6: memref<1x128xf32, #tpu.memory_space<vmem>>) attributes {dimension_semantics = [#tpu.dimension_semantics<parallel>], iteration_bounds = array<i64: 2>, scalar_prefetch = 0 : i64, scratch_operands = 0 : i64, tpu.core_type = #tpu.core_type<tc>, window_params = [{transform_indices = @transform_0, window_bounds = array<i64: 256, 4>}, {pipeline_mode = #tpu.pipeline_mode<synchronous>, transform_indices = @transform_1, window_bounds = array<i64: 4, 128>}, {pipeline_mode = #tpu.pipeline_mode<synchronous>, transform_indices = @transform_2, window_bounds = array<i64: 128, 4>}, {pipeline_mode = #tpu.pipeline_mode<synchronous>, transform_indices = @transform_3, window_bounds = array<i64: 1, 128>}, {transform_indices = @transform_4, window_bounds = array<i64: 256, 4>}, {transform_indices = @transform_5, window_bounds = array<i64: 1, 128>}]} {
    %c0 = arith.constant 0 : index
    %c0_0 = arith.constant 0 : index
    %0 = vector.load %arg1[%c0, %c0_0] : memref<256x4xf32, #tpu.memory_space<vmem>>, vector<256x4xf32>
    %1 = arith.truncf %0 : vector<256x4xf32> to vector<256x4xbf16>
    %c0_1 = arith.constant 0 : index
    %c0_2 = arith.constant 0 : index
    %2 = vector.load %arg2[%c0_1, %c0_2] : memref<4x128xbf16, #tpu.memory_space<vmem>>, vector<4x128xbf16>
    %cst = arith.constant dense<0.000000e+00> : vector<256x128xf32>
    %3 = tpu.matmul %1, %2, %cst {dimension_numbers = #tpu.dot_dimension_numbers<[1], [0], [0], [1], [0, 0, 1, 1], [], []>} : vector<256x4xbf16>, vector<4x128xbf16>, vector<256x128xf32> -> vector<256x128xf32>
    %c0_3 = arith.constant 0 : index
    %c0_4 = arith.constant 0 : index
    %4 = vector.load %arg4[%c0_3, %c0_4] : memref<1x128xf32, #tpu.memory_space<vmem>>, vector<1x128xf32>
    %cst_5 = arith.constant 2.000000e+00 : f32
    %5 = vector.broadcast %cst_5 : f32 to vector<256x128xf32>
    %6 = arith.mulf %5, %3 : vector<256x128xf32>
    %7 = vector.broadcast %4 : vector<1x128xf32> to vector<256x128xf32>
    %8 = arith.subf %7, %6 : vector<256x128xf32>
    %cst_6 = arith.constant dense<0x7F800000> : vector<256xf32>
    %9 = vector.multi_reduction <minimumf>, %8, %cst_6 [1] : vector<256x128xf32> to vector<256xf32>
    %10 = vector.shape_cast %9 : vector<256xf32> to vector<256x1xf32>
    %11 = tpu.iota {dimensions = array<i32: 1>} : vector<256x128xi32>
    %12 = vector.broadcast %10 : vector<256x1xf32> to vector<256x128xf32>
    %13 = arith.cmpf oeq, %8, %12 : vector<256x128xf32>
    %c128_i32 = arith.constant 128 : i32
    %14 = vector.broadcast %c128_i32 : i32 to vector<256x128xi32>
    %15 = arith.select %13, %11, %14 : vector<256x128xi1>, vector<256x128xi32>
    %cst_7 = arith.constant dense<2147483647> : vector<256xi32>
    %16 = vector.multi_reduction <minsi>, %15, %cst_7 [1] : vector<256x128xi32> to vector<256xi32>
    %17 = vector.shape_cast %16 : vector<256xi32> to vector<256x1xi32>
    %18 = vector.broadcast %17 : vector<256x1xi32> to vector<256x128xi32>
    %19 = arith.cmpi eq, %11, %18 : vector<256x128xi32>
    %20 = arith.extui %19 : vector<256x128xi1> to vector<256x128xi32>
    %21 = arith.sitofp %20 : vector<256x128xi32> to vector<256x128xf32>
    %c0_8 = arith.constant 0 : index
    %c0_9 = arith.constant 0 : index
    %22 = vector.load %arg3[%c0_8, %c0_9] : memref<128x4xf32, #tpu.memory_space<vmem>>, vector<128x4xf32>
    %cst_10 = arith.constant dense<0.000000e+00> : vector<256x4xf32>
    %23 = tpu.matmul %21, %22, %cst_10 {dimension_numbers = #tpu.dot_dimension_numbers<[1], [0], [0], [1], [0, 0, 1, 1], [], []>} : vector<256x128xf32>, vector<128x4xf32>, vector<256x4xf32> -> vector<256x4xf32>
    %c0_11 = arith.constant 0 : index
    %c0_12 = arith.constant 0 : index
    %24 = vector.load %arg5[%c0_11, %c0_12] : memref<256x4xf32, #tpu.memory_space<vmem>>, vector<256x4xf32>
    tpu.vector_store %arg5[%c0_11, %c0_12], %23 {strides = array<i32>} : memref<256x4xf32, #tpu.memory_space<vmem>>, vector<256x4xf32>,
    %c256_i32 = arith.constant 256 : i32
    %25 = arith.muli %arg0, %c256_i32 : i32
    %26 = tpu.iota {dimensions = array<i32: 0>} : vector<256x1xi32>
    %27 = vector.broadcast %25 : i32 to vector<256x1xi32>
    %28 = arith.addi %27, %26 : vector<256x1xi32>
    %c512_i32 = arith.constant 512 : i32
    %29 = vector.broadcast %c512_i32 : i32 to vector<256x1xi32>
    %30 = arith.cmpi slt, %28, %29 : vector<256x1xi32>
    %31 = arith.extui %30 : vector<256x1xi1> to vector<256x1xi32>
    %32 = arith.sitofp %31 : vector<256x1xi32> to vector<256x1xf32>
    %33 = arith.subf %23, %0 : vector<256x4xf32>
    %34 = arith.mulf %33, %33 : vector<256x4xf32>
    %35 = vector.broadcast %32 : vector<256x1xf32> to vector<256x4xf32>
    %36 = arith.mulf %34, %35 : vector<256x4xf32>
    %37 = vector.shape_cast %36 : vector<256x4xf32> to vector<1x256x4xf32>
    %cst_13 = arith.constant dense<0.000000e+00> : vector<1xf32>
    %38 = vector.multi_reduction <add>, %37, %cst_13 [1, 2] : vector<1x256x4xf32> to vector<1xf32>
    %39 = vector.shape_cast %38 : vector<1xf32> to vector<1x1x1xf32>
    %40 = vector.extract %39[0, 0, 0] : f32 from vector<1x1x1xf32>
    %41 = tpu.iota {dimensions = array<i32: 1>} : vector<1x128xi32>
    %c0_i32 = arith.constant 0 : i32
    %42 = vector.broadcast %c0_i32 : i32 to vector<1x128xi32>
    %43 = arith.cmpi eq, %41, %42 : vector<1x128xi32>
    %cst_14 = arith.constant 0.000000e+00 : f32
    %44 = vector.broadcast %40 : f32 to vector<1x128xf32>
    %45 = vector.broadcast %cst_14 : f32 to vector<1x128xf32>
    %46 = arith.select %43, %44, %45 : vector<1x128xi1>, vector<1x128xf32>
    %c0_15 = arith.constant 0 : index
    %c0_16 = arith.constant 0 : index
    %47 = vector.load %arg6[%c0_15, %c0_16] : memref<1x128xf32, #tpu.memory_space<vmem>>, vector<1x128xf32>
    tpu.vector_store %arg6[%c0_15, %c0_16], %46 {strides = array<i32>} : memref<1x128xf32, #tpu.memory_space<vmem>>, vector<1x128xf32>,
    return
  }
  func.func @transform_0(%arg0: i32) -> (i32, i32) {
    %c0_i32 = arith.constant 0 : i32
    %c0_i32_0 = arith.constant 0 : i32
    return %arg0, %c0_i32 : i32, i32
  }
  func.func @transform_1(%arg0: i32) -> (i32, i32) {
    %c0_i32 = arith.constant 0 : i32
    %c0_i32_0 = arith.constant 0 : i32
    %c0_i32_1 = arith.constant 0 : i32
    return %c0_i32, %c0_i32_0 : i32, i32
  }
  func.func @transform_2(%arg0: i32) -> (i32, i32) {
    %c0_i32 = arith.constant 0 : i32
    %c0_i32_0 = arith.constant 0 : i32
    %c0_i32_1 = arith.constant 0 : i32
    return %c0_i32, %c0_i32_0 : i32, i32
  }
  func.func @transform_3(%arg0: i32) -> (i32, i32) {
    %c0_i32 = arith.constant 0 : i32
    %c0_i32_0 = arith.constant 0 : i32
    %c0_i32_1 = arith.constant 0 : i32
    return %c0_i32, %c0_i32_0 : i32, i32
  }
  func.func @transform_4(%arg0: i32) -> (i32, i32) {
    %c0_i32 = arith.constant 0 : i32
    %c0_i32_0 = arith.constant 0 : i32
    return %arg0, %c0_i32 : i32, i32
  }
  func.func @transform_5(%arg0: i32) -> (i32, i32) {
    %c0_i32 = arith.constant 0 : i32
    %c0_i32_0 = arith.constant 0 : i32
    return %c0_i32, %arg0 : i32, i32
  }
}

</mosaic_0001>

<bundles_post_ra>
// kernel: vector_quantizer_forward.1
= control target key start
LH: loop header
LB: loop body
LE: loop exit
PB: predicated region body
PF: predicated region fallthrough
CT: control target
= control target key end

     0   :  { %s2356_s18 = smov 0   ;;  %s3425_s0 = inlined_call_operand.vmem [shape: f32[512,4], index: 0, kind: input, shape index: {}]   ;;  %s3426_s1 = inlined_call_operand.vmem [shape: bf16[4,128], index: 1, kind: input, shape index: {}]   ;;  %s3427_s2 = inlined_call_operand.vmem [shape: f32[128,4], index: 2, kind: input, shape index: {}]   ;;  %s3428_s3 = inlined_call_operand.vmem [shape: f32[1,128], index: 3, kind: input, shape index: {}]   ;;  %s3429_s4 = inlined_call_operand.vmem [shape: f32[512,4], index: 4, kind: output, shape index: {0}]   ;;  %s3430_s5 = inlined_call_operand.vmem [shape: f32[1,256], index: 5, kind: output, shape index: {1}]  }
   0x1 LB: > { %s2362_s19 = sadd.s32 4294967295, %s2322_s18   ;;  %p1939_p0 = scmp.ge.s32.totalorder %s2322_s18, 1  ;;  %s2322_s18 = sphi %s2356_s18, %s16_s18  }
   0x2   : > { %p191_p1 = scmp.lt.s32.totalorder %s2322_s18, 3 }
   0x4   : > { %p192_p2 = pnand %p1939_p0, %p191_p1 }
   0x6   : > { %195 = sbr.rel (%p192_p2) target bundleno = 1120 (0x460), region = 36 }
   0xb   : > { %v286_v0 = vld [vmem:[%s3426_s1] sm:$0x3]  ;;  %vm336_vm0 = vcmask 1041408   ;;  %s1940_s22 = sshll.u32 %s2362_s19, 5  ;;  %vm287_vm1 = vcmask 31744   ;;  %s2025_s16 = sshll.u32 %s2362_s19, 8 }
   0xc   : > { %2271 = vmatprep.subr.msk.bf16.mxu0 %vm336_vm0, %v286_v0  ;;  %v338_v1 = vsel %vm336_vm0, %v286_v0, 0  ;;  %p223_p3 = scmp.lt.s32.totalorder %s1940_s22, 63  ;;  %v2431_v51 = vld [vmem:[%s3428_s3] ss:$0 sm:$0xff]  ;;  %p234_p4 = scmp.lt.s32.totalorder %s2362_s19, 1 }
   0xd   : > { %2126 = vmatpush3.bf16.msra.mxu0 %v338_v1 }
   0xe   : > { %s3468_s22 = smov (!%p223_p3, %s1940_s22), 63  ;;  %s3470_s19 = smov (!%p234_p4, %s2362_s19), 1 }
   0xf   : > { %s1941_s23 = sshll.u32 %s3468_s22, 3 }
  0x10   : > { %s2378_s26 = scalar_lea.vmem %s3425_s0, %s1941_s23  ;;  %s3149_s21 = scalar_lea.vmem %s3429_s4, %s1941_s23 }
  0x11   : > { %v238_v2 = vld [vmem:[%s2378_s26] sm:$0xff]  ;;  %v239_v3 = vld [vmem:[%s2378_s26 + $0x8] sm:$0xff]  ;;  %v240_v4 = vld [vmem:[%s2378_s26 + $0x10] sm:$0xff] }
  0x12   : > { %v270_v5 = vpack.c.bf16 %v239_v3, %v238_v2  ;;  %v241_v6 = vld [vmem:[%s2378_s26 + $0x18] sm:$0xff]  ;;  %v242_v7 = vld [vmem:[%s2378_s26 + $0x20] sm:$0xff]  ;;  %v243_v8 = vld [vmem:[%s2378_s26 + $0x28] sm:$0xff] }
  0x13   : > { %v271_v9 = vpack.c.bf16 %v241_v6, %v240_v4  ;;  %v272_v10 = vpack.c.bf16 %v243_v8, %v242_v7  ;;  %v244_v11 = vld [vmem:[%s2378_s26 + $0x30] sm:$0xff]  ;;  %v245_v12 = vld [vmem:[%s2378_s26 + $0x38] sm:$0xff]  ;;  %v246_v13 = vld [vmem:[%s2378_s26 + $0x40] sm:$0xff] }
  0x14   : > { %2127 = vmatprep.mubr.msk.bf16.mxu0 %vm287_vm1, %v270_v5  ;;  %v247_v14 = vld [vmem:[%s2378_s26 + $0x48] sm:$0xff]  ;;  %v273_v15 = vpack.c.bf16 %v245_v12, %v244_v11  ;;  %v248_v17 = vld [vmem:[%s2378_s26 + $0x50] sm:$0xff]  ;;  %v249_v18 = vld [vmem:[%s2378_s26 + $0x58] sm:$0xff] }
  0x15   : > { %2128 = vmatmul.mubr.msk.bf16.vlgmr.msra.gmra.mxu0 %vm287_vm1, %v271_v9  ;;  %v274_v16 = vpack.c.bf16 %v247_v14, %v246_v13  ;;  %v250_v19 = vld [vmem:[%s2378_s26 + $0x60] sm:$0xff]  ;;  %v251_v20 = vld [vmem:[%s2378_s26 + $0x68] sm:$0xff]  ;;  %v275_v21 = vpack.c.bf16 %v249_v18, %v248_v17  ;;  %v252_v23 = vld [vmem:[%s2378_s26 + $0x70] sm:$0xff] }
  0x16   : > { %2131 = vmatprep.mubr.msk.bf16.mxu0 %vm287_vm1, %v272_v10  ;;  %v276_v22 = vpack.c.bf16 %v251_v20, %v250_v19  ;;  %v253_v24 = vld [vmem:[%s2378_s26 + $0x78] sm:$0xff]  ;;  %v254_v25 = vld [vmem:[%s2378_s26 + $0x80] sm:$0xff]  ;;  %v255_v26 = vld [vmem:[%s2378_s26 + $0x88] sm:$0xff] }
  0x17   : > { %v277_v27 = vpack.c.bf16 %v253_v24, %v252_v23  ;;  %v278_v28 = vpack.c.bf16 %v255_v26, %v254_v25  ;;  %v256_v29 = vld [vmem:[%s2378_s26 + $0x90] sm:$0xff]  ;;  %v257_v30 = vld [vmem:[%s2378_s26 + $0x98] sm:$0xff]  ;;  %v258_v31 = vld [vmem:[%s2378_s26 + $0xa0] sm:$0xff] }
  0x18   : > { %v259_v32 = vld [vmem:[%s2378_s26 + $0xa8] sm:$0xff]  ;;  %v279_v33 = vpack.c.bf16 %v257_v30, %v256_v29  ;;  %v260_v35 = vld [vmem:[%s2378_s26 + $0xb0] sm:$0xff]  ;;  %v261_v36 = vld [vmem:[%s2378_s26 + $0xb8] sm:$0xff] }
  0x19   : > { %v280_v34 = vpack.c.bf16 %v259_v32, %v258_v31  ;;  %v262_v37 = vld [vmem:[%s2378_s26 + $0xc0] sm:$0xff]  ;;  %v263_v38 = vld [vmem:[%s2378_s26 + $0xc8] sm:$0xff]  ;;  %v281_v39 = vpack.c.bf16 %v261_v36, %v260_v35  ;;  %v264_v41 = vld [vmem:[%s2378_s26 + $0xd0] sm:$0xff] }
  0x1a   : > { %v282_v40 = vpack.c.bf16 %v263_v38, %v262_v37  ;;  %v265_v42 = vld [vmem:[%s2378_s26 + $0xd8] sm:$0xff]  ;;  %v266_v43 = vld [vmem:[%s2378_s26 + $0xe0] sm:$0xff]  ;;  %v267_v44 = vld [vmem:[%s2378_s26 + $0xe8] sm:$0xff] }
  0x1b   : > { %v283_v45 = vpack.c.bf16 %v265_v42, %v264_v41  ;;  %v284_v46 = vpack.c.bf16 %v267_v44, %v266_v43  ;;  %v268_v47 = vld [vmem:[%s2378_s26 + $0xf0] sm:$0xff]  ;;  %v269_v48 = vld [vmem:[%s2378_s26 + $0xf8] sm:$0xff] }
  0x1c   : > { %v285_v49 = vpack.c.bf16 %v269_v48, %v268_v47 }
  0x1d   : > { %2132 = vmatmul.mubr.msk.bf16.gmra.mxu0 %vm287_vm1, %v273_v15 }
  0x1e   : > { %2135 = vmatprep.mubr.msk.bf16.mxu0 %vm287_vm1, %v274_v16 }
  0x25   : > { %2136 = vmatmul.mubr.msk.bf16.gmra.mxu0 %vm287_vm1, %v275_v21 }
  0x26   : > { %2139 = vmatprep.mubr.msk.bf16.mxu0 %vm287_vm1, %v276_v22 }
  0x2d   : > { %2140 = vmatmul.mubr.msk.bf16.gmra.mxu0 %vm287_vm1, %v277_v27 }
  0x2e   : > { %2143 = vmatprep.mubr.msk.bf16.mxu0 %vm287_vm1, %v278_v28 }
  0x35   : > { %2144 = vmatmul.mubr.msk.bf16.gmra.mxu0 %vm287_vm1, %v279_v33 }
  0x36   : > { %2147 = vmatprep.mubr.msk.bf16.mxu0 %vm287_vm1, %v280_v34 }
  0x3d   : > { %2148 = vmatmul.mubr.msk.bf16.gmra.mxu0 %vm287_vm1, %v281_v39 }
  0x3e   : > { %2151 = vmatprep.mubr.msk.bf16.mxu0 %vm287_vm1, %v282_v40 }
  0x45   : > { %2152 = vmatmul.mubr.msk.bf16.gmra.mxu0 %vm287_vm1, %v283_v45 }
  0x46   : > { %2155 = vmatprep.mubr.msk.bf16.mxu0 %vm287_vm1, %v284_v46 }
  0x4d   : > { %2156 = vmatmul.mubr.msk.bf16.gmra.mxu0 %vm287_vm1, %v285_v49 }
  0xd5   : > { %v2129_v50 = vpop.f32.mrf.mxu0 }
  0xd6   : > { %v504_v52 = vmul.f32 2.0, %v2129_v50 }
  0xd7   : > { %v374_v53 = vpop.f32.mrf.mxu0 }
  0xd8   : > { %v502_v54 = vmul.f32 2.0, %v374_v53  ;;  %v2434_v55 = vsub.f32 %v2431_v51, %v504_v52 }
  0xd9   : > { %v2130_v56 = vpop.f32.mrf.mxu0 }
  0xda   : > { %v505_v57 = vmul.f32 2.0, %v2130_v56  ;;  %576 = vmin.xlane.f32.xlu1 %v2434_v55  ;;  %v2438_v58 = vsub.f32 %v2431_v51, %v502_v54 }
  0xdb   : > { %v377_v59 = vpop.f32.mrf.mxu0 }
  0xdc   : > { %v503_v60 = vmul.f32 2.0, %v377_v59  ;;  %572 = vmin.xlane.f32.xlu0 %v2438_v58  ;;  %v2442_v61 = vsub.f32 %v2431_v51, %v505_v57 }
  0xdd   : > { %v2133_v62 = vpop.f32.mrf.mxu0 }
  0xde   : > { %578 = vmin.xlane.f32.xlu1 %v2442_v61  ;;  %v2446_v63 = vsub.f32 %v2431_v51, %v503_v60  ;;  %v508_v3 = vmul.f32 2.0, %v2133_v62 }
  0xdf   : > { %v390_v0 = vpop.f32.mrf.mxu0 }
  0xe0   : > { %v506_v1 = vmul.f32 2.0, %v390_v0  ;;  %574 = vmin.xlane.f32.xlu0 %v2446_v63  ;;  %v2454_v9 = vsub.f32 %v2431_v51, %v508_v3 }
  0xe1   : > { %v2134_v2 = vpop.f32.mrf.mxu0 }
  0xe2   : > { %v2450_v4 = vsub.f32 %v2431_v51, %v506_v1  ;;  %v509_v8 = vmul.f32 2.0, %v2134_v2 }
  0xe3   : > { %v393_v5 = vpop.f32.mrf.mxu0 }
  0xe4   : > { %v507_v6 = vmul.f32 2.0, %v393_v5  ;;  %580 = vmin.xlane.f32.xlu0 %v2450_v4  ;;  %v2462_v15 = vsub.f32 %v2431_v51, %v509_v8 }
  0xe5   : > { %v2137_v7 = vpop.f32.mrf.mxu0 }
  0xe6   : > { %v2457_v10 = vsub.f32 %v2431_v51, %v507_v6  ;;  %v512_v14 = vmul.f32 2.0, %v2137_v7 }
  0xe7   : > { %v406_v11 = vpop.f32.mrf.mxu0 }
  0xe8   : > { %v510_v12 = vmul.f32 2.0, %v406_v11  ;;  %584 = vmin.xlane.f32.xlu0 %v2454_v9  ;;  %582 = vmin.xlane.f32.xlu1 %v2457_v10  ;;  %v2470_v21 = vsub.f32 %v2431_v51, %v512_v14 }
  0xe9   : > { %v2138_v13 = vpop.f32.mrf.mxu0 }
  0xea   : > { %v2465_v16 = vsub.f32 %v2431_v51, %v510_v12  ;;  %v513_v20 = vmul.f32 2.0, %v2138_v13 }
  0xeb   : > { %v409_v17 = vpop.f32.mrf.mxu0 }
  0xec   : > { %v511_v18 = vmul.f32 2.0, %v409_v17  ;;  %586 = vmin.xlane.f32.xlu1 %v2462_v15  ;;  %588 = vmin.xlane.f32.xlu0 %v2465_v16  ;;  %v2478_v27 = vsub.f32 %v2431_v51, %v513_v20 }
  0xed   : > { %v2141_v19 = vpop.f32.mrf.mxu0 }
  0xee   : > { %v2473_v22 = vsub.f32 %v2431_v51, %v511_v18  ;;  %v516_v26 = vmul.f32 2.0, %v2141_v19 }
  0xef   : > { %v422_v23 = vpop.f32.mrf.mxu0 }
  0xf0   : > { %v514_v24 = vmul.f32 2.0, %v422_v23  ;;  %592 = vmin.xlane.f32.xlu0 %v2470_v21  ;;  %590 = vmin.xlane.f32.xlu1 %v2473_v22  ;;  %v2486_v33 = vsub.f32 %v2431_v51, %v516_v26 }
  0xf1   : > { %v2142_v25 = vpop.f32.mrf.mxu0 }
  0xf2   : > { %v2481_v28 = vsub.f32 %v2431_v51, %v514_v24  ;;  %v517_v32 = vmul.f32 2.0, %v2142_v25 }
  0xf3   : > { %v425_v29 = vpop.f32.mrf.mxu0 }
  0xf4   : > { %v515_v30 = vmul.f32 2.0, %v425_v29  ;;  %594 = vmin.xlane.f32.xlu1 %v2478_v27  ;;  %596 = vmin.xlane.f32.xlu0 %v2481_v28  ;;  %v2494_v39 = vsub.f32 %v2431_v51, %v517_v32 }
  0xf5   : > { %v2145_v31 = vpop.f32.mrf.mxu0 }
  0xf6   : > { %v2489_v34 = vsub.f32 %v2431_v51, %v515_v30  ;;  %v520_v38 = vmul.f32 2.0, %v2145_v31 }
  0xf7   : > { %v438_v35 = vpop.f32.mrf.mxu0 }
  0xf8   : > { %v518_v36 = vmul.f32 2.0, %v438_v35  ;;  %600 = vmin.xlane.f32.xlu0 %v2486_v33  ;;  %598 = vmin.xlane.f32.xlu1 %v2489_v34  ;;  %v2502_v45 = vsub.f32 %v2431_v51, %v520_v38  ;;  %v3431_v35 = vlaneseq }
  0xf9   : > { %v2146_v37 = vpop.f32.mrf.mxu0 }
  0xfa   : > { %v2497_v40 = vsub.f32 %v2431_v51, %v518_v36  ;;  %v521_v44 = vmul.f32 2.0, %v2146_v37  ;;  %v2562_v36 = vand.u32 127, %v3431_v35 }
  0xfb   : > { %v441_v41 = vpop.f32.mrf.mxu0 }
  0xfc   : > { %v519_v42 = vmul.f32 2.0, %v441_v41  ;;  %602 = vmin.xlane.f32.xlu1 %v2494_v39  ;;  %604 = vmin.xlane.f32.xlu0 %v2497_v40  ;;  %v2510_v52 = vsub.f32 %v2431_v51, %v521_v44  ;;  %3444 = vst [vmem:[#allocation2_spill] sm:$0xff] %v2562_v36 }
  0xfd   : > { %v2149_v43 = vpop.f32.mrf.mxu0 }
  0xfe   : > { %v2505_v46 = vsub.f32 %v2431_v51, %v519_v42  ;;  %v524_v50 = vmul.f32 2.0, %v2149_v43 }
  0xff   : > { %v454_v47 = vpop.f32.mrf.mxu0 }
 0x100   : > { %v522_v48 = vmul.f32 2.0, %v454_v47  ;;  %608 = vmin.xlane.f32.xlu0 %v2502_v45  ;;  %606 = vmin.xlane.f32.xlu1 %v2505_v46  ;;  %v2518_v60 = vsub.f32 %v2431_v51, %v524_v50 }
 0x101   : > { %v2150_v49 = vpop.f32.mrf.mxu0 }
 0x102   : > { %v2513_v53 = vsub.f32 %v2431_v51, %v522_v48  ;;  %v525_v59 = vmul.f32 2.0, %v2150_v49 }
 0x103   : > { %v457_v54 = vpop.f32.mrf.mxu0 }
 0x104   : > { %v523_v56 = vmul.f32 2.0, %v457_v54  ;;  %610 = vmin.xlane.f32.xlu1 %v2510_v52  ;;  %612 = vmin.xlane.f32.xlu0 %v2513_v53  ;;  %v2526_v5 = vsub.f32 %v2431_v51, %v525_v59 }
 0x105   : > { %v2153_v57 = vpop.f32.mrf.mxu0 }
 0x106   : > { %v2521_v62 = vsub.f32 %v2431_v51, %v523_v56  ;;  %v528_v3 = vmul.f32 2.0, %v2153_v57 }
 0x107   : > { %v470_v0 = vpop.f32.mrf.mxu0 }
 0x108   : > { %v526_v1 = vmul.f32 2.0, %v470_v0  ;;  %616 = vmin.xlane.f32.xlu0 %v2518_v60  ;;  %614 = vmin.xlane.f32.xlu1 %v2521_v62  ;;  %v2534_v13 = vsub.f32 %v2431_v51, %v528_v3 }
 0x109   : > { %v2154_v2 = vpop.f32.mrf.mxu0 }
 0x10a   : > { %v2529_v6 = vsub.f32 %v2431_v51, %v526_v1  ;;  %v529_v12 = vmul.f32 2.0, %v2154_v2 }
 0x10b   : > { %v473_v7 = vpop.f32.mrf.mxu0 }
 0x10c   : > { %v527_v8 = vmul.f32 2.0, %v473_v7  ;;  %618 = vmin.xlane.f32.xlu1 %v2526_v5  ;;  %620 = vmin.xlane.f32.xlu0 %v2529_v6  ;;  %v2542_v23 = vsub.f32 %v2431_v51, %v529_v12 }
 0x10d   : > { %v2157_v11 = vpop.f32.mrf.mxu0 }
 0x10e   : > { %v2537_v14 = vsub.f32 %v2431_v51, %v527_v8  ;;  %v532_v20 = vmul.f32 2.0, %v2157_v11 }
 0x10f   : > { %v486_v17 = vpop.f32.mrf.mxu0 }
 0x110   : > { %v530_v18 = vmul.f32 2.0, %v486_v17  ;;  %624 = vmin.xlane.f32.xlu0 %v2534_v13  ;;  %622 = vmin.xlane.f32.xlu1 %v2537_v14  ;;  %v2550_v30 = vsub.f32 %v2431_v51, %v532_v20 }
 0x111   : > { %v2158_v19 = vpop.f32.mrf.mxu0 }
 0x112   : > { %v2545_v24 = vsub.f32 %v2431_v51, %v530_v18  ;;  %v533_v29 = vmul.f32 2.0, %v2158_v19 }
 0x113   : > { %v489_v25 = vpop.f32.mrf.mxu0 }
 0x114   : > { %v531_v26 = vmul.f32 2.0, %v489_v25  ;;  %626 = vmin.xlane.f32.xlu1 %v2542_v23  ;;  %628 = vmin.xlane.f32.xlu0 %v2545_v24  ;;  %v2558_v32 = vsub.f32 %v2431_v51, %v533_v29 }
 0x116   : > { %v2553_v31 = vsub.f32 %v2431_v51, %v531_v26 }
 0x118   : > { %632 = vmin.xlane.f32.xlu0 %v2550_v30  ;;  %630 = vmin.xlane.f32.xlu1 %v2553_v31 }
 0x11c   : > { %634 = vmin.xlane.f32.xlu1 %v2558_v32 }
 0x163   : > { %v577_v37 = vpop.xlane.xlu1 %576 }
 0x164   : > { %vm640_vm2 = vcmp.eq.f32.partialorder %v2434_v55, %v577_v37 }
 0x165   : > { %v573_v38 = vpop.xlane.xlu0 %572  ;;  %v2567_v41 = vsel %vm640_vm2, %v2562_v36, 128 }
 0x166   : > { %vm638_vm3 = vcmp.eq.f32.partialorder %v2438_v58, %v573_v38  ;;  %v731_v55 = vshra.s32 %v2567_v41, 16 }
 0x167   : > { %v2570_v42 = vsel %vm638_vm3, %v2562_v36, 128  ;;  %v579_v51 = vpop.xlane.xlu1 %578 }
 0x168   : > { %vm641_vm4 = vcmp.eq.f32.partialorder %v2442_v61, %v579_v51  ;;  %v703_v43 = vshra.s32 %v2570_v42, 16  ;;  %v2587_v50 = vcvt.s32.f32 %v731_v55 }
 0x169   : > { %v575_v44 = vpop.xlane.xlu0 %574  ;;  %v2579_v58 = vsel %vm641_vm4, %v2562_v36, 128 }
 0x16a   : > { %vm639_vm5 = vcmp.eq.f32.partialorder %v2446_v63, %v575_v44  ;;  %v2575_v47 = vcvt.s32.f32 %v703_v43  ;;  %v745_v54 = vshra.s32 %v2579_v58, 16 }
 0x16b   : > { %v2582_v48 = vsel %vm639_vm5, %v2562_v36, 128 }
 0x16c   : > { %706 = vmin.xlane.f32.xlu0 %v2575_v47  ;;  %v717_v49 = vshra.s32 %v2582_v48, 16  ;;  %v2602_v1 = vcvt.s32.f32 %v745_v54 }
 0x16d   : > { %v581_v61 = vpop.xlane.xlu0 %580 }
 0x16e   : > { %vm642_vm6 = vcmp.eq.f32.partialorder %v2450_v4, %v581_v61  ;;  %v2589_v63 = vcvt.s32.f32 %v717_v49 }
 0x16f   : > { %v2593_v56 = vsel %vm642_vm6, %v2562_v36, 128 }
 0x170   : > { %734 = vmin.xlane.f32.xlu0 %v2587_v50  ;;  %720 = vmin.xlane.f32.xlu1 %v2589_v63  ;;  %v759_v57 = vshra.s32 %v2593_v56, 16 }
 0x171   : > { %v585_v59 = vpop.xlane.xlu0 %584  ;;  %v583_v0 = vpop.xlane.xlu1 %582 }
 0x172   : > { %vm644_vm7 = vcmp.eq.f32.partialorder %v2454_v9, %v585_v59  ;;  %vm643_vm8 = vcmp.eq.f32.partialorder %v2457_v10, %v583_v0  ;;  %v2600_v4 = vcvt.s32.f32 %v759_v57 }
 0x173   : > { %v2605_v2 = vsel %vm644_vm7, %v2562_v36, 128  ;;  %v2608_v3 = vsel %vm643_vm8, %v2562_v36, 128 }
 0x174   : > { %762 = vmin.xlane.f32.xlu0 %v2600_v4  ;;  %748 = vmin.xlane.f32.xlu1 %v2602_v1  ;;  %v787_v7 = vshra.s32 %v2605_v2, 16  ;;  %v773_v9 = vshra.s32 %v2608_v3, 16 }
 0x175   : > { %v587_v8 = vpop.xlane.xlu1 %586  ;;  %v589_v10 = vpop.xlane.xlu0 %588 }
 0x176   : > { %vm645_vm9 = vcmp.eq.f32.partialorder %v2462_v15, %v587_v8  ;;  %vm646_vm10 = vcmp.eq.f32.partialorder %v2465_v16, %v589_v10  ;;  %v2616_v11 = vcvt.s32.f32 %v787_v7  ;;  %v2618_v12 = vcvt.s32.f32 %v773_v9 }
 0x177   : > { %v2621_v17 = vsel %vm645_vm9, %v2562_v36, 128  ;;  %v2624_v18 = vsel %vm646_vm10, %v2562_v36, 128 }
 0x178   : > { %790 = vmin.xlane.f32.xlu0 %v2616_v11  ;;  %776 = vmin.xlane.f32.xlu1 %v2618_v12  ;;  %v815_v19 = vshra.s32 %v2624_v18, 16  ;;  %v801_v15 = vshra.s32 %v2621_v17, 16 }
 0x179   : > { %v593_v20 = vpop.xlane.xlu0 %592  ;;  %v591_v16 = vpop.xlane.xlu1 %590 }
 0x17a   : > { %vm648_vm11 = vcmp.eq.f32.partialorder %v2470_v21, %v593_v20  ;;  %vm647_vm12 = vcmp.eq.f32.partialorder %v2473_v22, %v591_v16  ;;  %v2632_v25 = vcvt.s32.f32 %v815_v19  ;;  %v2634_v26 = vcvt.s32.f32 %v801_v15 }
 0x17b   : > { %v2637_v29 = vsel %vm648_vm11, %v2562_v36, 128  ;;  %v2640_v37 = vsel %vm647_vm12, %v2562_v36, 128 }
 0x17c   : > { %818 = vmin.xlane.f32.xlu0 %v2632_v25  ;;  %804 = vmin.xlane.f32.xlu1 %v2634_v26  ;;  %v843_v38 = vshra.s32 %v2637_v29, 16  ;;  %v829_v21 = vshra.s32 %v2640_v37, 16 }
 0x17d   : > { %v595_v51 = vpop.xlane.xlu1 %594  ;;  %v597_v22 = vpop.xlane.xlu0 %596 }
 0x17e   : > { %vm649_vm13 = vcmp.eq.f32.partialorder %v2478_v27, %v595_v51  ;;  %vm650_vm14 = vcmp.eq.f32.partialorder %v2481_v28, %v597_v22  ;;  %v2648_v43 = vcvt.s32.f32 %v843_v38  ;;  %v2650_v44 = vcvt.s32.f32 %v829_v21 }
 0x17f   : > { %v2653_v55 = vsel %vm649_vm13, %v2562_v36, 128  ;;  %v2656_v49 = vsel %vm650_vm14, %v2562_v36, 128 }
 0x180   : > { %846 = vmin.xlane.f32.xlu0 %v2648_v43  ;;  %832 = vmin.xlane.f32.xlu1 %v2650_v44  ;;  %v871_v61 = vshra.s32 %v2656_v49, 16  ;;  %v857_v27 = vshra.s32 %v2653_v55, 16 }
 0x181   : > { %v601_v54 = vpop.xlane.xlu0 %600  ;;  %v599_v28 = vpop.xlane.xlu1 %598 }
 0x182   : > { %vm652_vm15 = vcmp.eq.f32.partialorder %v2486_v33, %v601_v54  ;;  %vm651_vm0 = vcmp.eq.f32.partialorder %v2489_v34, %v599_v28  ;;  %v2664_v57 = vcvt.s32.f32 %v871_v61  ;;  %v2666_v59 = vcvt.s32.f32 %v857_v27 }
 0x183   : > { %v2669_v0 = vsel %vm652_vm15, %v2562_v36, 128  ;;  %v2672_v7 = vsel %vm651_vm0, %v2562_v36, 128 }
 0x184   : > { %874 = vmin.xlane.f32.xlu0 %v2664_v57  ;;  %860 = vmin.xlane.f32.xlu1 %v2666_v59  ;;  %v899_v9 = vshra.s32 %v2669_v0, 16  ;;  %v885_v33 = vshra.s32 %v2672_v7, 16 }
 0x185   : > { %v603_v8 = vpop.xlane.xlu1 %602  ;;  %v605_v34 = vpop.xlane.xlu0 %604 }
 0x186   : > { %vm653_vm2 = vcmp.eq.f32.partialorder %v2494_v39, %v603_v8  ;;  %vm654_vm3 = vcmp.eq.f32.partialorder %v2497_v40, %v605_v34  ;;  %v2680_v10 = vcvt.s32.f32 %v899_v9  ;;  %v2682_v19 = vcvt.s32.f32 %v885_v33 }
 0x187   : > { %v2685_v15 = vsel %vm653_vm2, %v2562_v36, 128  ;;  %v2688_v20 = vsel %vm654_vm3, %v2562_v36, 128 }
 0x188   : > { %902 = vmin.xlane.f32.xlu0 %v2680_v10  ;;  %888 = vmin.xlane.f32.xlu1 %v2682_v19  ;;  %v927_v16 = vshra.s32 %v2688_v20, 16  ;;  %v913_v39 = vshra.s32 %v2685_v15, 16 }
 0x189   : > { %v609_v38 = vpop.xlane.xlu0 %608  ;;  %v607_v40 = vpop.xlane.xlu1 %606 }
 0x18a   : > { %vm656_vm4 = vcmp.eq.f32.partialorder %v2502_v45, %v609_v38  ;;  %vm655_vm5 = vcmp.eq.f32.partialorder %v2505_v46, %v607_v40  ;;  %v2696_v21 = vcvt.s32.f32 %v927_v16  ;;  %v2698_v51 = vcvt.s32.f32 %v913_v39 }
 0x18b   : > { %v2701_v22 = vsel %vm656_vm4, %v2562_v36, 128  ;;  %v2704_v61 = vsel %vm655_vm5, %v2562_v36, 128 }
 0x18c   : > { %930 = vmin.xlane.f32.xlu0 %v2696_v21  ;;  %916 = vmin.xlane.f32.xlu1 %v2698_v51  ;;  %v955_v27 = vshra.s32 %v2701_v22, 16  ;;  %v941_v45 = vshra.s32 %v2704_v61, 16 }
 0x18d   : > { %v611_v54 = vpop.xlane.xlu1 %610  ;;  %v613_v46 = vpop.xlane.xlu0 %612 }
 0x18e   : > { %vm657_vm6 = vcmp.eq.f32.partialorder %v2510_v52, %v611_v54  ;;  %vm658_vm7 = vcmp.eq.f32.partialorder %v2513_v53, %v613_v46  ;;  %v2712_v28 = vcvt.s32.f32 %v955_v27  ;;  %v2714_v9 = vcvt.s32.f32 %v941_v45 }
 0x18f   : > { %v2717_v33 = vsel %vm657_vm6, %v2562_v36, 128  ;;  %v2720_v8 = vsel %vm658_vm7, %v2562_v36, 128 }
 0x190   : > { %958 = vmin.xlane.f32.xlu0 %v2712_v28  ;;  %944 = vmin.xlane.f32.xlu1 %v2714_v9  ;;  %v983_v34 = vshra.s32 %v2720_v8, 16  ;;  %v969_v52 = vshra.s32 %v2717_v33, 16 }
 0x191   : > { %v617_v16 = vpop.xlane.xlu0 %616  ;;  %v615_v53 = vpop.xlane.xlu1 %614 }
 0x192   : > { %vm660_vm8 = vcmp.eq.f32.partialorder %v2518_v60, %v617_v16  ;;  %vm659_vm9 = vcmp.eq.f32.partialorder %v2521_v62, %v615_v53  ;;  %v2728_v39 = vcvt.s32.f32 %v983_v34  ;;  %v2730_v38 = vcvt.s32.f32 %v969_v52 }
 0x193   : > { %v2733_v40 = vsel %vm660_vm8, %v2562_v36, 128  ;;  %v2736_v27 = vsel %vm659_vm9, %v2562_v36, 128 }
 0x194   : > { %986 = vmin.xlane.f32.xlu0 %v2728_v39  ;;  %972 = vmin.xlane.f32.xlu1 %v2730_v38  ;;  %v1011_v45 = vshra.s32 %v2733_v40, 16  ;;  %v997_v60 = vshra.s32 %v2736_v27, 16 }
 0x195   : > { %v619_v54 = vpop.xlane.xlu1 %618  ;;  %v621_v62 = vpop.xlane.xlu0 %620 }
 0x196   : > { %vm661_vm10 = vcmp.eq.f32.partialorder %v2526_v5, %v619_v54  ;;  %vm662_vm11 = vcmp.eq.f32.partialorder %v2529_v6, %v621_v62  ;;  %v2744_v46 = vcvt.s32.f32 %v1011_v45  ;;  %v2746_v34 = vcvt.s32.f32 %v997_v60 }
 0x197   : > { %v2749_v52 = vsel %vm661_vm10, %v2562_v36, 128  ;;  %v2752_v16 = vsel %vm662_vm11, %v2562_v36, 128 }
 0x198   : > { %3445 = vst [vmem:[#allocation3_spill] sm:$0xff] %v2746_v34  ;;  %1014 = vmin.xlane.f32.xlu0 %v2744_v46  ;;  %1000 = vmin.xlane.f32.xlu1 %v2746_v34  ;;  %v1039_v53 = vshra.s32 %v2752_v16, 16  ;;  %v1025_v5 = vshra.s32 %v2749_v52, 16 }
 0x199   : > { %v625_v54 = vpop.xlane.xlu0 %624  ;;  %v623_v6 = vpop.xlane.xlu1 %622 }
 0x19a   : > { %vm664_vm12 = vcmp.eq.f32.partialorder %v2534_v13, %v625_v54  ;;  %vm663_vm13 = vcmp.eq.f32.partialorder %v2537_v14, %v623_v6  ;;  %v2760_v45 = vcvt.s32.f32 %v1039_v53  ;;  %v2762_v60 = vcvt.s32.f32 %v1025_v5 }
 0x19b   : > { %v2765_v62 = vsel %vm664_vm12, %v2562_v36, 128  ;;  %v2768_v35 = vsel %vm663_vm13, %v2562_v36, 128 }
 0x19c   : > { %3446 = vst [vmem:[#allocation4_spill] sm:$0xff] %v2760_v45  ;;  %3447 = vst [vmem:[#allocation5_spill] sm:$0xff] %v2762_v60  ;;  %1042 = vmin.xlane.f32.xlu0 %v2760_v45  ;;  %1028 = vmin.xlane.f32.xlu1 %v2762_v60  ;;  %v1067_v34 = vshra.s32 %v2765_v62, 16  ;;  %v1053_v13 = vshra.s32 %v2768_v35, 16 }
 0x19d   : > { %v627_v54 = vpop.xlane.xlu1 %626  ;;  %v629_v14 = vpop.xlane.xlu0 %628 }
 0x19e   : > { %vm665_vm14 = vcmp.eq.f32.partialorder %v2542_v23, %v627_v54  ;;  %vm666_vm15 = vcmp.eq.f32.partialorder %v2545_v24, %v629_v14  ;;  %v2776_v53 = vcvt.s32.f32 %v1067_v34  ;;  %v2778_v5 = vcvt.s32.f32 %v1053_v13 }
 0x19f   : > { %v2781_v6 = vsel %vm665_vm14, %v2562_v36, 128  ;;  %v2784_v45 = vsel %vm666_vm15, %v2562_v36, 128 }
 0x1a0   : > { %3448 = vst [vmem:[#allocation6_spill] sm:$0xff] %v2776_v53  ;;  %3449 = vst [vmem:[#allocation7_spill] sm:$0xff] %v2778_v5  ;;  %1070 = vmin.xlane.f32.xlu0 %v2776_v53  ;;  %1056 = vmin.xlane.f32.xlu1 %v2778_v5  ;;  %v1095_v60 = vshra.s32 %v2784_v45, 16  ;;  %v1081_v23 = vshra.s32 %v2781_v6, 16 }
 0x1a1   : > { %v633_v54 = vpop.xlane.xlu0 %632  ;;  %v631_v24 = vpop.xlane.xlu1 %630 }
 0x1a2   : > { %vm668_vm0 = vcmp.eq.f32.partialorder %v2550_v30, %v633_v54  ;;  %vm667_vm2 = vcmp.eq.f32.partialorder %v2553_v31, %v631_v24  ;;  %v2792_v34 = vcvt.s32.f32 %v1095_v60  ;;  %v2794_v13 = vcvt.s32.f32 %v1081_v23 }
 0x1a3   : > { %v2797_v14 = vsel %vm668_vm0, %v2562_v36, 128  ;;  %v2800_v53 = vsel %vm667_vm2, %v2562_v36, 128 }
 0x1a4   : > { %3450 = vst [vmem:[#allocation8_spill] sm:$0xff] %v2794_v13  ;;  %1098 = vmin.xlane.f32.xlu0 %v2792_v34  ;;  %1084 = vmin.xlane.f32.xlu1 %v2794_v13  ;;  %v1123_v5 = vshra.s32 %v2797_v14, 16  ;;  %v1109_v30 = vshra.s32 %v2800_v53, 16 }
 0x1a5   : > { %v635_v54 = vpop.xlane.xlu1 %634 }
 0x1a6   : > { %vm669_vm3 = vcmp.eq.f32.partialorder %v2558_v32, %v635_v54  ;;  %v2807_v31 = vcvt.s32.f32 %v1123_v5  ;;  %v2809_v60 = vcvt.s32.f32 %v1109_v30  ;;  %v1261_v32 = vld [vmem:[%s3427_s2 + $0x78] sm:$0xff]  ;;  %v1260_v5 = vld [vmem:[%s3427_s2 + $0x70] sm:$0xff]  ;;  %v1259_v30 = vld [vmem:[%s3427_s2 + $0x68] sm:$0xff] }
 0x1a7   : > { %v2812_v23 = vsel %vm669_vm3, %v2562_v36, 128  ;;  %2159 = vmatprep.subr.mxu0 %v1261_v32  ;;  %2239 = vmatprep.subr.mxu1 %v1261_v32  ;;  %v1258_v54 = vld [vmem:[%s3427_s2 + $0x60] sm:$0xff]  ;;  %v716_v36 = vand.u32 65535, %v2582_v48 }
 0x1a8   : > { %3451 = vst [vmem:[#allocation9_spill] sm:$0xff] %v2807_v31  ;;  %3452 = vst [vmem:[#allocation10_spill] sm:$0xff] %v2809_v60  ;;  %1126 = vmin.xlane.f32.xlu0 %v2807_v31  ;;  %1112 = vmin.xlane.f32.xlu1 %v2809_v60  ;;  %v1137_v24 = vshra.s32 %v2812_v23, 16  ;;  %v758_v31 = vand.u32 65535, %v2593_v56  ;;  %v772_v56 = vand.u32 65535, %v2608_v3  ;;  %v814_v3 = vand.u32 65535, %v2624_v18 }
 0x1a9   : > { %3453 = vst [vmem:[#allocation11_spill] sm:$0xff] %v2812_v23  ;;  %2160 = vmatpush3.msra.mxu0 %v1261_v32  ;;  %2255 = vmatpush3.msra.mxu1 %v1261_v32  ;;  %v1256_v32 = vld [vmem:[%s3427_s2 + $0x50] sm:$0xff]  ;;  %v842_v18 = vand.u32 65535, %v2637_v29 }
 0x1aa   : > { %v2817_v13 = vcvt.s32.f32 %v1137_v24  ;;  %2161 = vmatprep.subr.mxu0 %v1260_v5  ;;  %2240 = vmatprep.subr.mxu1 %v1260_v5  ;;  %v1257_v24 = vld [vmem:[%s3427_s2 + $0x58] sm:$0xff] }
 0x1ab   : > { %2162 = vmatpush3.msra.mxu0 %v1260_v5  ;;  %2256 = vmatpush3.msra.mxu1 %v1260_v5  ;;  %v1255_v5 = vld [vmem:[%s3427_s2 + $0x48] sm:$0xff] }
 0x1ac   : > { %3454 = vst [vmem:[#allocation12_spill] sm:$0xff] %v2817_v13  ;;  %1140 = vmin.xlane.f32.xlu1 %v2817_v13  ;;  %2163 = vmatprep.subr.mxu0 %v1259_v30 }
 0x1ad   : > { %2241 = vmatprep.subr.mxu1 %v1259_v30  ;;  %2164 = vmatpush3.msra.mxu0 %v1259_v30 }
 0x1ae   : > { %2257 = vmatpush3.msra.mxu1 %v1259_v30  ;;  %2165 = vmatprep.subr.mxu0 %v1258_v54  ;;  %v1254_v30 = vld [vmem:[%s3427_s2 + $0x40] sm:$0xff] }
 0x1af   : > { %2242 = vmatprep.subr.mxu1 %v1258_v54  ;;  %2166 = vmatpush3.msra.mxu0 %v1258_v54 }
 0x1b0   : > { %2258 = vmatpush3.msra.mxu1 %v1258_v54  ;;  %2167 = vmatprep.subr.mxu0 %v1257_v24  ;;  %v1253_v54 = vld [vmem:[%s3427_s2 + $0x38] sm:$0xff] }
 0x1b1   : > { %2243 = vmatprep.subr.mxu1 %v1257_v24  ;;  %2168 = vmatpush3.msra.mxu0 %v1257_v24 }
 0x1b2   : > { %2259 = vmatpush3.msra.mxu1 %v1257_v24  ;;  %2169 = vmatprep.subr.mxu0 %v1256_v32  ;;  %v1252_v24 = vld [vmem:[%s3427_s2 + $0x30] sm:$0xff] }
 0x1b3   : > { %2244 = vmatprep.subr.mxu1 %v1256_v32  ;;  %2170 = vmatpush3.msra.mxu0 %v1256_v32 }
 0x1b4   : > { %2260 = vmatpush3.msra.mxu1 %v1256_v32  ;;  %2171 = vmatprep.subr.mxu0 %v1255_v5  ;;  %v1251_v32 = vld [vmem:[%s3427_s2 + $0x28] sm:$0xff] }
 0x1b5   : > { %2245 = vmatprep.subr.mxu1 %v1255_v5  ;;  %2172 = vmatpush3.msra.mxu0 %v1255_v5 }
 0x1b6   : > { %2261 = vmatpush3.msra.mxu1 %v1255_v5  ;;  %2173 = vmatprep.subr.mxu0 %v1254_v30  ;;  %v1250_v5 = vld [vmem:[%s3427_s2 + $0x20] sm:$0xff] }
 0x1b7   : > { %2246 = vmatprep.subr.mxu1 %v1254_v30  ;;  %2174 = vmatpush3.msra.mxu0 %v1254_v30 }
 0x1b8   : > { %2262 = vmatpush3.msra.mxu1 %v1254_v30  ;;  %2175 = vmatprep.subr.mxu0 %v1253_v54  ;;  %v1249_v30 = vld [vmem:[%s3427_s2 + $0x18] sm:$0xff] }
 0x1b9   : > { %2247 = vmatprep.subr.mxu1 %v1253_v54  ;;  %2176 = vmatpush3.msra.mxu0 %v1253_v54 }
 0x1ba   : > { %2263 = vmatpush3.msra.mxu1 %v1253_v54  ;;  %2177 = vmatprep.subr.mxu0 %v1252_v24  ;;  %v1248_v54 = vld [vmem:[%s3427_s2 + $0x10] sm:$0xff] }
 0x1bb   : > { %2248 = vmatprep.subr.mxu1 %v1252_v24  ;;  %2178 = vmatpush3.msra.mxu0 %v1252_v24 }
 0x1bc   : > { %2264 = vmatpush3.msra.mxu1 %v1252_v24  ;;  %2179 = vmatprep.subr.mxu0 %v1251_v32  ;;  %v702_v24 = vand.u32 65535, %v2570_v42 }
 0x1bd   : > { %2249 = vmatprep.subr.mxu1 %v1251_v32  ;;  %2180 = vmatpush3.msra.mxu0 %v1251_v32 }
 0x1be   : > { %2265 = vmatpush3.msra.mxu1 %v1251_v32  ;;  %2181 = vmatprep.subr.mxu0 %v1250_v5  ;;  %v730_v32 = vand.u32 65535, %v2567_v41  ;;  %v704_v60 = vcvt.s32.f32 %v702_v24  ;;  %v718_v41 = vcvt.s32.f32 %v716_v36 }
 0x1bf   : > { %2250 = vmatprep.subr.mxu1 %v1250_v5  ;;  %2182 = vmatpush3.msra.mxu0 %v1250_v5 }
 0x1c0   : > { %2266 = vmatpush3.msra.mxu1 %v1250_v5  ;;  %2183 = vmatprep.subr.mxu0 %v1249_v30  ;;  %v732_v42 = vcvt.s32.f32 %v730_v32  ;;  %v760_v32 = vcvt.s32.f32 %v758_v31 }
 0x1c1   : > { %2251 = vmatprep.subr.mxu1 %v1249_v30  ;;  %2184 = vmatpush3.msra.mxu0 %v1249_v30 }
 0x1c2   : > { %2267 = vmatpush3.msra.mxu1 %v1249_v30  ;;  %2185 = vmatprep.subr.mxu0 %v1248_v54  ;;  %v744_v30 = vand.u32 65535, %v2579_v58  ;;  %v786_v58 = vand.u32 65535, %v2605_v2  ;;  %v800_v2 = vand.u32 65535, %v2621_v17  ;;  %v1247_v17 = vld [vmem:[%s3427_s2 + $0x8] sm:$0xff] }
 0x1c3   : > { %2252 = vmatprep.subr.mxu1 %v1248_v54  ;;  %2186 = vmatpush3.msra.mxu0 %v1248_v54 }
 0x1c4   : > { %2268 = vmatpush3.msra.mxu1 %v1248_v54  ;;  %v746_v36 = vcvt.s32.f32 %v744_v30  ;;  %v788_v31 = vcvt.s32.f32 %v786_v58  ;;  %v774_v30 = vcvt.s32.f32 %v772_v56  ;;  %v802_v58 = vcvt.s32.f32 %v800_v2  ;;  %2187 = vmatprep.subr.mxu0 %v1247_v17 }
 0x1c5   : > { %2253 = vmatprep.subr.mxu1 %v1247_v17  ;;  %2188 = vmatpush3.msra.mxu0 %v1247_v17  ;;  %v870_v56 = vand.u32 65535, %v2656_v49  ;;  %v898_v49 = vand.u32 65535, %v2669_v0  ;;  %v884_v2 = vand.u32 65535, %v2672_v7  ;;  %v912_v0 = vand.u32 65535, %v2685_v15 }
 0x1c6   : > { %2269 = vmatpush3.msra.mxu1 %v1247_v17  ;;  %v926_v7 = vand.u32 65535, %v2688_v20  ;;  %v954_v15 = vand.u32 65535, %v2701_v22  ;;  %v940_v20 = vand.u32 65535, %v2704_v61  ;;  %v968_v22 = vand.u32 65535, %v2717_v33 }
 0x1c7   : > { %v982_v61 = vand.u32 65535, %v2720_v8  ;;  %v1010_v33 = vand.u32 65535, %v2733_v40  ;;  %v996_v8 = vand.u32 65535, %v2736_v27  ;;  %v1024_v40 = vand.u32 65535, %v2749_v52 }
 0x1c8   : > { %v1038_v27 = vand.u32 65535, %v2752_v16  ;;  %v1066_v52 = vand.u32 65535, %v2765_v62  ;;  %v1052_v16 = vand.u32 65535, %v2768_v35  ;;  %v1080_v62 = vand.u32 65535, %v2781_v6 }
 0x1c9   : > { %v1094_v35 = vand.u32 65535, %v2784_v45  ;;  %v1122_v6 = vand.u32 65535, %v2797_v14  ;;  %v1108_v45 = vand.u32 65535, %v2800_v53 }
 0x1f5   : > { %v2865_v13 = vpop.xlane.xlu0 %706 }
 0x1f6   : > { %vm708_vm4 = vcmp.eq.f32.partialorder %v2575_v47, %v2865_v13 }
 0x1f7   : > { %v709_v5 = vsel %vm708_vm4, %v704_v60, inf }
 0x1f8   : > { %710 = vmin.xlane.f32.xlu0 %v709_v5 }
 0x1f9   : > { %v2871_v23 = vpop.xlane.xlu0 %734  ;;  %v2873_v54 = vpop.xlane.xlu1 %720 }
 0x1fa   : > { %vm736_vm5 = vcmp.eq.f32.partialorder %v2587_v50, %v2871_v23  ;;  %vm722_vm6 = vcmp.eq.f32.partialorder %v2589_v63, %v2873_v54 }
 0x1fb   : > { %v737_v48 = vsel %vm736_vm5, %v732_v42, inf  ;;  %v723_v47 = vsel %vm722_vm6, %v718_v41, inf  ;;  %v828_v41 = vand.u32 65535, %v2640_v37  ;;  %v856_v37 = vand.u32 65535, %v2653_v55 }
 0x1fc   : > { %738 = vmin.xlane.f32.xlu0 %v737_v48  ;;  %724 = vmin.xlane.f32.xlu1 %v723_v47 }
 0x1fd   : > { %v2881_v60 = vpop.xlane.xlu0 %762  ;;  %v2883_v24 = vpop.xlane.xlu1 %748 }
 0x1fe   : > { %vm764_vm7 = vcmp.eq.f32.partialorder %v2600_v4, %v2881_v60  ;;  %vm750_vm8 = vcmp.eq.f32.partialorder %v2602_v1, %v2883_v24 }
 0x1ff   : > { %v765_v50 = vsel %vm764_vm7, %v760_v32, inf  ;;  %v751_v63 = vsel %vm750_vm8, %v746_v36, inf }
 0x200   : > { %766 = vmin.xlane.f32.xlu0 %v765_v50  ;;  %752 = vmin.xlane.f32.xlu1 %v751_v63  ;;  %v844_v50 = vcvt.s32.f32 %v842_v18  ;;  %v830_v63 = vcvt.s32.f32 %v828_v41  ;;  %v900_v18 = vcvt.s32.f32 %v898_v49  ;;  %v886_v41 = vcvt.s32.f32 %v884_v2 }
 0x201   : > { %v2891_v5 = vpop.xlane.xlu0 %790  ;;  %v2893_v42 = vpop.xlane.xlu1 %776  ;;  %v970_v49 = vcvt.s32.f32 %v968_v22  ;;  %v3459_v22 = vld [vmem:[#allocation7_spill] sm:$0xff] }
 0x202   : > { %vm792_vm9 = vcmp.eq.f32.partialorder %v2616_v11, %v2891_v5  ;;  %vm778_vm10 = vcmp.eq.f32.partialorder %v2618_v12, %v2893_v42  ;;  %v816_v11 = vcvt.s32.f32 %v814_v3 }
 0x203   : > { %v793_v4 = vsel %vm792_vm9, %v788_v31, inf  ;;  %v779_v1 = vsel %vm778_vm10, %v774_v30, inf  ;;  %v858_v30 = vcvt.s32.f32 %v856_v37 }
 0x204   : > { %794 = vmin.xlane.f32.xlu0 %v793_v4  ;;  %780 = vmin.xlane.f32.xlu1 %v779_v1 }
 0x205   : > { %v2904_v48 = vpop.xlane.xlu0 %818  ;;  %v2906_v47 = vpop.xlane.xlu1 %804 }
 0x206   : > { %vm820_vm11 = vcmp.eq.f32.partialorder %v2632_v25, %v2904_v48  ;;  %vm806_vm12 = vcmp.eq.f32.partialorder %v2634_v26, %v2906_v47  ;;  %v1246_v25 = vld [vmem:[%s3427_s2] sm:$0xff] }
 0x207   : > { %v821_v12 = vsel %vm820_vm11, %v816_v11, inf  ;;  %v807_v29 = vsel %vm806_vm12, %v802_v58, inf  ;;  %2189 = vmatprep.subr.mxu0 %v1246_v25  ;;  %2254 = vmatprep.subr.mxu1 %v1246_v25 }
 0x208   : > { %822 = vmin.xlane.f32.xlu0 %v821_v12  ;;  %808 = vmin.xlane.f32.xlu1 %v807_v29  ;;  %v928_v12 = vcvt.s32.f32 %v926_v7  ;;  %v914_v29 = vcvt.s32.f32 %v912_v0 }
 0x209   : > { %v2914_v32 = vpop.xlane.xlu0 %846  ;;  %v2916_v36 = vpop.xlane.xlu1 %832  ;;  %2190 = vmatpush3.msra.mxu0 %v1246_v25  ;;  %2270 = vmatpush3.msra.mxu1 %v1246_v25 }
 0x20a   : > { %vm848_vm13 = vcmp.eq.f32.partialorder %v2648_v43, %v2914_v32  ;;  %vm834_vm14 = vcmp.eq.f32.partialorder %v2650_v44, %v2916_v36  ;;  %v872_v43 = vcvt.s32.f32 %v870_v56 }
 0x20b   : > { %v849_v26 = vsel %vm848_vm13, %v844_v50, inf  ;;  %v835_v55 = vsel %vm834_vm14, %v830_v63, inf  ;;  %v956_v50 = vcvt.s32.f32 %v954_v15  ;;  %v942_v63 = vcvt.s32.f32 %v940_v20 }
 0x20c   : > { %850 = vmin.xlane.f32.xlu0 %v849_v26  ;;  %836 = vmin.xlane.f32.xlu1 %v835_v55  ;;  %v984_v55 = vcvt.s32.f32 %v982_v61 }
 0x20d   : > { %v2927_v3 = vpop.xlane.xlu0 %874  ;;  %v2929_v31 = vpop.xlane.xlu1 %860 }
 0x20e   : > { %vm876_vm15 = vcmp.eq.f32.partialorder %v2664_v57, %v2927_v3  ;;  %vm862_vm0 = vcmp.eq.f32.partialorder %v2666_v59, %v2929_v31 }
 0x20f   : > { %v877_v44 = vsel %vm876_vm15, %v872_v43, inf  ;;  %v863_v4 = vsel %vm862_vm0, %v858_v30, inf  ;;  %v1012_v30 = vcvt.s32.f32 %v1010_v33  ;;  %v1082_v33 = vcvt.s32.f32 %v1080_v62 }
 0x210   : > { %878 = vmin.xlane.f32.xlu0 %v877_v44  ;;  %864 = vmin.xlane.f32.xlu1 %v863_v4  ;;  %v998_v44 = vcvt.s32.f32 %v996_v8  ;;  %v3460_v8 = vld [vmem:[#allocation8_spill] sm:$0xff] }
 0x211   : > { %v2937_v1 = vpop.xlane.xlu0 %902  ;;  %v2939_v17 = vpop.xlane.xlu1 %888 }
 0x212   : > { %vm904_vm2 = vcmp.eq.f32.partialorder %v2680_v10, %v2937_v1  ;;  %vm890_vm3 = vcmp.eq.f32.partialorder %v2682_v19, %v2939_v17 }
 0x213   : > { %v905_v57 = vsel %vm904_vm2, %v900_v18, inf  ;;  %v891_v59 = vsel %vm890_vm3, %v886_v41, inf  ;;  %v1040_v18 = vcvt.s32.f32 %v1038_v27  ;;  %v1026_v41 = vcvt.s32.f32 %v1024_v40 }
 0x214   : > { %906 = vmin.xlane.f32.xlu0 %v905_v57  ;;  %892 = vmin.xlane.f32.xlu1 %v891_v59  ;;  %v3456_v57 = vld [vmem:[#allocation4_spill] sm:$0xff]  ;;  %v1124_v40 = vcvt.s32.f32 %v1122_v6  ;;  %v1110_v27 = vcvt.s32.f32 %v1108_v45  ;;  %v3465_v45 = vld [vmem:[#allocation2_spill] sm:$0xff] }
 0x215   : > { %v2947_v11 = vpop.xlane.xlu0 %930  ;;  %v2949_v58 = vpop.xlane.xlu1 %916 }
 0x216   : > { %vm932_vm4 = vcmp.eq.f32.partialorder %v2696_v21, %v2947_v11  ;;  %vm918_vm5 = vcmp.eq.f32.partialorder %v2698_v51, %v2949_v58 }
 0x217   : > { %v933_v10 = vsel %vm932_vm4, %v928_v12, inf  ;;  %v919_v19 = vsel %vm918_vm5, %v914_v29, inf  ;;  %v1068_v29 = vcvt.s32.f32 %v1066_v52  ;;  %v3464_v52 = vld [vmem:[#allocation12_spill] sm:$0xff] }
 0x218   : > { %934 = vmin.xlane.f32.xlu0 %v933_v10  ;;  %920 = vmin.xlane.f32.xlu1 %v919_v19  ;;  %v1054_v10 = vcvt.s32.f32 %v1052_v16  ;;  %v3458_v19 = vld [vmem:[#allocation6_spill] sm:$0xff] }
 0x219   : > { %v2957_v37 = vpop.xlane.xlu0 %958  ;;  %v2959_v56 = vpop.xlane.xlu1 %944 }
 0x21a   : > { %vm960_vm6 = vcmp.eq.f32.partialorder %v2712_v28, %v2957_v37  ;;  %vm946_vm7 = vcmp.eq.f32.partialorder %v2714_v9, %v2959_v56 }
 0x21b   : > { %v961_v21 = vsel %vm960_vm6, %v956_v50, inf  ;;  %v947_v51 = vsel %vm946_vm7, %v942_v63, inf }
 0x21c   : > { %962 = vmin.xlane.f32.xlu0 %v961_v21  ;;  %948 = vmin.xlane.f32.xlu1 %v947_v51  ;;  %v1096_v51 = vcvt.s32.f32 %v1094_v35 }
 0x21d   : > { %v2967_v25 = vpop.xlane.xlu0 %986  ;;  %v2969_v26 = vpop.xlane.xlu1 %972 }
 0x21e   : > { %vm988_vm8 = vcmp.eq.f32.partialorder %v2728_v39, %v2967_v25  ;;  %vm974_vm9 = vcmp.eq.f32.partialorder %v2730_v38, %v2969_v26  ;;  %v3455_v39 = vld [vmem:[#allocation3_spill] sm:$0xff] }
 0x21f   : > { %v989_v28 = vsel %vm988_vm8, %v984_v55, inf  ;;  %v975_v9 = vsel %vm974_vm9, %v970_v49, inf }
 0x220   : > { %990 = vmin.xlane.f32.xlu0 %v989_v28  ;;  %976 = vmin.xlane.f32.xlu1 %v975_v9  ;;  %v3461_v28 = vld [vmem:[#allocation11_spill] sm:$0xff] }
 0x221   : > { %v2977_v2 = vpop.xlane.xlu0 %1014  ;;  %v2979_v43 = vpop.xlane.xlu1 %1000  ;;  %v1136_v14 = vand.u32 65535, %v3461_v28 }
 0x222   : > { %vm1016_vm10 = vcmp.eq.f32.partialorder %v2744_v46, %v2977_v2  ;;  %vm1002_vm11 = vcmp.eq.f32.partialorder %v3455_v39, %v2979_v43  ;;  %v3457_v46 = vld [vmem:[#allocation5_spill] sm:$0xff] }
 0x223   : > { %v1017_v38 = vsel %vm1016_vm10, %v1012_v30, inf  ;;  %v1003_v4 = vsel %vm1002_vm11, %v998_v44, inf  ;;  %v3462_v30 = vld [vmem:[#allocation9_spill] sm:$0xff] }
 0x224   : > { %1018 = vmin.xlane.f32.xlu0 %v1017_v38  ;;  %1004 = vmin.xlane.f32.xlu1 %v1003_v4  ;;  %v1138_v4 = vcvt.s32.f32 %v1136_v14 }
 0x225   : > { %v2987_v0 = vpop.xlane.xlu0 %1042  ;;  %v2989_v7 = vpop.xlane.xlu1 %1028 }
 0x226   : > { %vm1044_vm12 = vcmp.eq.f32.partialorder %v3456_v57, %v2987_v0  ;;  %vm1030_vm13 = vcmp.eq.f32.partialorder %v3457_v46, %v2989_v7 }
 0x227   : > { %v1045_v59 = vsel %vm1044_vm12, %v1040_v18, inf  ;;  %v1031_v15 = vsel %vm1030_vm13, %v1026_v41, inf  ;;  %v713_v18 = vcvt.f32.s32 %v2865_v13  ;;  %v741_v41 = vcvt.f32.s32 %v2871_v23 }
 0x228   : > { %1046 = vmin.xlane.f32.xlu0 %v1045_v59  ;;  %1032 = vmin.xlane.f32.xlu1 %v1031_v15  ;;  %v727_v59 = vcvt.f32.s32 %v2873_v54  ;;  %v2324_v13 = vmov 1.0  }
 0x229   : > { %v2997_v20 = vpop.xlane.xlu0 %1070  ;;  %v2999_v12 = vpop.xlane.xlu1 %1056  ;;  %v714_v46 = vshll.u32 %v713_v18, 16  ;;  %v742_v35 = vshll.u32 %v741_v41, 16 }
 0x22a   : > { %vm1072_vm14 = vcmp.eq.f32.partialorder %v3458_v19, %v2997_v20  ;;  %vm1058_vm15 = vcmp.eq.f32.partialorder %v3459_v22, %v2999_v12 }
 0x22b   : > { %v1073_v61 = vsel %vm1072_vm14, %v1068_v29, inf  ;;  %v1059_v50 = vsel %vm1058_vm15, %v1054_v10, inf  ;;  %v769_v29 = vcvt.f32.s32 %v2881_v60  ;;  %v755_v10 = vcvt.f32.s32 %v2883_v24 }
 0x22c   : > { %1074 = vmin.xlane.f32.xlu0 %v1073_v61  ;;  %1060 = vmin.xlane.f32.xlu1 %v1059_v50  ;;  %v728_v61 = vshll.u32 %v727_v59, 16  ;;  %v783_v60 = vcvt.f32.s32 %v2893_v42  ;;  %v811_v42 = vcvt.f32.s32 %v2906_v47  ;;  %v839_v47 = vcvt.f32.s32 %v2916_v36 }
 0x22d   : > { %v3007_v63 = vpop.xlane.xlu0 %1098  ;;  %v3009_v21 = vpop.xlane.xlu1 %1084  ;;  %v770_v54 = vshll.u32 %v769_v29, 16  ;;  %v867_v36 = vcvt.f32.s32 %v2929_v31  ;;  %v895_v31 = vcvt.f32.s32 %v2939_v17  ;;  %v923_v17 = vcvt.f32.s32 %v2949_v58 }
 0x22e   : > { %vm1100_vm0 = vcmp.eq.f32.partialorder %v2792_v34, %v3007_v63  ;;  %vm1086_vm2 = vcmp.eq.f32.partialorder %v3460_v8, %v3009_v21  ;;  %v3463_v34 = vld [vmem:[#allocation10_spill] sm:$0xff]  ;;  %v797_v8 = vcvt.f32.s32 %v2891_v5  ;;  %v825_v5 = vcvt.f32.s32 %v2904_v48 }
 0x22f   : > { %v1101_v55 = vsel %vm1100_vm0, %v1096_v51, inf  ;;  %v1087_v49 = vsel %vm1086_vm2, %v1082_v33, inf  ;;  %v756_v33 = vshll.u32 %v755_v10, 16  ;;  %v812_v41 = vshll.u32 %v811_v42, 16 }
 0x230   : > { %1102 = vmin.xlane.f32.xlu0 %v1101_v55  ;;  %1088 = vmin.xlane.f32.xlu1 %v1087_v49  ;;  %v826_v18 = vshll.u32 %v825_v5, 16  ;;  %v853_v48 = vcvt.f32.s32 %v2914_v32  ;;  %v840_v10 = vshll.u32 %v839_v47, 16  ;;  %v881_v32 = vcvt.f32.s32 %v2927_v3 }
 0x231   : > { %v3016_v9 = vpop.xlane.xlu0 %1126  ;;  %v3018_v53 = vpop.xlane.xlu1 %1112  ;;  %v909_v3 = vcvt.f32.s32 %v2937_v1  ;;  %v937_v1 = vcvt.f32.s32 %v2947_v11  ;;  %v965_v11 = vcvt.f32.s32 %v2957_v37  ;;  %v951_v58 = vcvt.f32.s32 %v2959_v56 }
 0x232   : > { %vm1128_vm3 = vcmp.eq.f32.partialorder %v3462_v30, %v3016_v9  ;;  %vm1114_vm4 = vcmp.eq.f32.partialorder %v3463_v34, %v3018_v53  ;;  %v784_v30 = vshll.u32 %v783_v60, 16  ;;  %v854_v29 = vshll.u32 %v853_v48, 16 }
 0x233   : > { %v1129_v44 = vsel %vm1128_vm3, %v1124_v40, inf  ;;  %v1115_v39 = vsel %vm1114_vm4, %v1110_v27, inf  ;;  %v798_v27 = vshll.u32 %v797_v8, 16  ;;  %v966_v47 = vshll.u32 %v965_v11, 16 }
 0x234   : > { %1130 = vmin.xlane.f32.xlu0 %v1129_v44  ;;  %1116 = vmin.xlane.f32.xlu1 %v1115_v39  ;;  %v993_v37 = vcvt.f32.s32 %v2967_v25  ;;  %v979_v56 = vcvt.f32.s32 %v2969_v26  ;;  %v1021_v25 = vcvt.f32.s32 %v2977_v2  ;;  %v1007_v26 = vcvt.f32.s32 %v2979_v43 }
 0x235   : > { %v3024_v38 = vpop.xlane.xlu1 %1140  ;;  %v1049_v2 = vcvt.f32.s32 %v2987_v0  ;;  %v1035_v43 = vcvt.f32.s32 %v2989_v7  ;;  %v1077_v0 = vcvt.f32.s32 %v2997_v20  ;;  %v1063_v7 = vcvt.f32.s32 %v2999_v12 }
 0x236   : > { %vm1142_vm5 = vcmp.eq.f32.partialorder %v3464_v52, %v3024_v38  ;;  %v1105_v20 = vcvt.f32.s32 %v3007_v63  ;;  %v1091_v12 = vcvt.f32.s32 %v3009_v21  ;;  %v1133_v63 = vcvt.f32.s32 %v3016_v9 }
 0x237   : > { %v1143_v16 = vsel %vm1142_vm5, %v1138_v4, inf  ;;  %v1119_v21 = vcvt.f32.s32 %v3018_v53  ;;  %v1147_v9 = vcvt.f32.s32 %v3024_v38 }
 0x238   : > { %1144 = vmin.xlane.f32.xlu1 %v1143_v16 }
 0x281   : > { %v711_v57 = vpop.xlane.xlu0 %710 }
 0x282   : > { %v712_v15 = vcvt.f32.s32 %v711_v57 }
 0x284   : > { %v715_v62 = vadd.s32 %v714_v46, %v712_v15 }
 0x285   : > { %v739_v19 = vpop.xlane.xlu0 %738  ;;  %v725_v22 = vpop.xlane.xlu1 %724 }
 0x286   : > { %v740_v50 = vcvt.f32.s32 %v739_v19  ;;  %v726_v6 = vcvt.f32.s32 %v725_v22  ;;  %vm1150_vm6 = vcmp.eq.s32.totalorder %v3465_v45, %v715_v62 }
 0x287   : > { %2191 = vmatprep.mubr.msk.f32.mxu0 %vm1150_vm6, %v2324_v13 }
 0x288   : > { %v743_v23 = vadd.s32 %v742_v35, %v740_v50  ;;  %v729_v51 = vadd.s32 %v728_v61, %v726_v6 }
 0x289   : > { %v767_v55 = vpop.xlane.xlu0 %766  ;;  %v753_v24 = vpop.xlane.xlu1 %752 }
 0x28a   : > { %vm1151_vm7 = vcmp.eq.s32.totalorder %v3465_v45, %v729_v51  ;;  %v768_v49 = vcvt.f32.s32 %v767_v55  ;;  %v754_v28 = vcvt.f32.s32 %v753_v24  ;;  %vm1152_vm8 = vcmp.eq.s32.totalorder %v3465_v45, %v743_v23 }
 0x28b   : > { %2192 = vmatmul.mubr.msk.f32.vlgmr.msra.gmra.mxu0 %vm1151_vm7, %v2324_v13  ;;  %v882_v51 = vshll.u32 %v881_v32, 16  ;;  %v980_v32 = vshll.u32 %v979_v56, 16 }
 0x28c   : > { %v771_v14 = vadd.s32 %v770_v54, %v768_v49  ;;  %v757_v40 = vadd.s32 %v756_v33, %v754_v28  ;;  %2194 = vmatprep.mubr.msk.f32.mxu0 %vm1152_vm8, %v2324_v13  ;;  %v868_v54 = vshll.u32 %v867_v36, 16  ;;  %v910_v28 = vshll.u32 %v909_v3, 16 }
 0x28d   : > { %v795_v34 = vpop.xlane.xlu0 %794  ;;  %v781_v44 = vpop.xlane.xlu1 %780 }
 0x28e   : > { %v796_v39 = vcvt.f32.s32 %v795_v34  ;;  %v782_v4 = vcvt.f32.s32 %v781_v44  ;;  %vm1153_vm9 = vcmp.eq.s32.totalorder %v3465_v45, %v757_v40  ;;  %vm1154_vm10 = vcmp.eq.s32.totalorder %v3465_v45, %v771_v14 }
 0x28f   : > { %2195 = vmatmul.mubr.msk.f32.gmra.mxu0 %vm1153_vm9, %v2324_v13  ;;  %v896_v14 = vshll.u32 %v895_v31, 16  ;;  %v938_v44 = vshll.u32 %v937_v1, 16 }
 0x290   : > { %v785_v52 = vadd.s32 %v784_v30, %v782_v4  ;;  %2197 = vmatprep.mubr.msk.f32.mxu0 %vm1154_vm10, %v2324_v13  ;;  %v799_v16 = vadd.s32 %v798_v27, %v796_v39  ;;  %v924_v39 = vshll.u32 %v923_v17, 16 }
 0x291   : > { %v823_v57 = vpop.xlane.xlu0 %822  ;;  %v809_v46 = vpop.xlane.xlu1 %808 }
 0x292   : > { %v824_v59 = vcvt.f32.s32 %v823_v57  ;;  %v810_v15 = vcvt.f32.s32 %v809_v46  ;;  %vm1155_vm11 = vcmp.eq.s32.totalorder %v3465_v45, %v785_v52  ;;  %vm1156_vm12 = vcmp.eq.s32.totalorder %v3465_v45, %v799_v16 }
 0x293   : > { %2198 = vmatmul.mubr.msk.f32.gmra.mxu0 %vm1155_vm11, %v2324_v13  ;;  %2200 = vmatprep.mubr.msk.f32.mxu1 %vm1156_vm12, %v2324_v13  ;;  %v952_v57 = vshll.u32 %v951_v58, 16  ;;  %v1106_v58 = vshll.u32 %v1105_v20, 16 }
 0x294   : > { %v827_v62 = vadd.s32 %v826_v18, %v824_v59  ;;  %v813_v35 = vadd.s32 %v812_v41, %v810_v15 }
 0x295   : > { %v851_v19 = vpop.xlane.xlu0 %850  ;;  %v837_v22 = vpop.xlane.xlu1 %836 }
 0x296   : > { %v852_v61 = vcvt.f32.s32 %v851_v19  ;;  %v838_v50 = vcvt.f32.s32 %v837_v22  ;;  %vm1157_vm13 = vcmp.eq.s32.totalorder %v3465_v45, %v813_v35  ;;  %vm1158_vm14 = vcmp.eq.s32.totalorder %v3465_v45, %v827_v62 }
 0x297   : > { %2201 = vmatmul.mubr.msk.f32.vlgmr.msra.gmra.mxu1 %vm1157_vm13, %v2324_v13 }
 0x298   : > { %v855_v6 = vadd.s32 %v854_v29, %v852_v61  ;;  %v841_v23 = vadd.s32 %v840_v10, %v838_v50  ;;  %2203 = vmatprep.mubr.msk.f32.mxu1 %vm1158_vm14, %v2324_v13  ;;  %v994_v10 = vshll.u32 %v993_v37, 16  ;;  %v1120_v37 = vshll.u32 %v1119_v21, 16 }
 0x299   : > { %v879_v33 = vpop.xlane.xlu0 %878  ;;  %v865_v8 = vpop.xlane.xlu1 %864 }
 0x29a   : > { %v880_v60 = vcvt.f32.s32 %v879_v33  ;;  %v866_v55 = vcvt.f32.s32 %v865_v8  ;;  %vm1159_vm15 = vcmp.eq.s32.totalorder %v3465_v45, %v841_v23  ;;  %vm1160_vm0 = vcmp.eq.s32.totalorder %v3465_v45, %v855_v6 }
 0x29b   : > { %2204 = vmatmul.mubr.msk.f32.gmra.mxu1 %vm1159_vm15, %v2324_v13  ;;  %v1022_v23 = vshll.u32 %v1021_v25, 16 }
 0x29c   : > { %v883_v24 = vadd.s32 %v882_v51, %v880_v60  ;;  %v869_v49 = vadd.s32 %v868_v54, %v866_v55  ;;  %2206 = vmatprep.mubr.msk.f32.mxu1 %vm1160_vm0, %v2324_v13  ;;  %v1008_v51 = vshll.u32 %v1007_v26, 16  ;;  %v1050_v55 = vshll.u32 %v1049_v2, 16 }
 0x29d   : > { %v907_v40 = vpop.xlane.xlu0 %906  ;;  %v893_v27 = vpop.xlane.xlu1 %892 }
 0x29e   : > { %v908_v30 = vcvt.f32.s32 %v907_v40  ;;  %v894_v5 = vcvt.f32.s32 %v893_v27  ;;  %vm1161_vm2 = vcmp.eq.s32.totalorder %v3465_v45, %v869_v49  ;;  %vm1162_vm3 = vcmp.eq.s32.totalorder %v3465_v45, %v883_v24 }
 0x29f   : > { %2207 = vmatmul.mubr.msk.f32.gmra.mxu1 %vm1161_vm2, %v2324_v13  ;;  %v1036_v24 = vshll.u32 %v1035_v43, 16  ;;  %v1078_v27 = vshll.u32 %v1077_v0, 16 }
 0x2a0   : > { %v911_v42 = vadd.s32 %v910_v28, %v908_v30  ;;  %v897_v34 = vadd.s32 %v896_v14, %v894_v5  ;;  %2209 = vmatprep.mubr.msk.f32.mxu1 %vm1162_vm3, %v2324_v13  ;;  %v1064_v30 = vshll.u32 %v1063_v7, 16 }
 0x2a1   : > { %v935_v4 = vpop.xlane.xlu0 %934  ;;  %v921_v52 = vpop.xlane.xlu1 %920 }
 0x2a2   : > { %v936_v16 = vcvt.f32.s32 %v935_v4  ;;  %v922_v18 = vcvt.f32.s32 %v921_v52  ;;  %vm1163_vm4 = vcmp.eq.s32.totalorder %v3465_v45, %v897_v34  ;;  %vm1164_vm5 = vcmp.eq.s32.totalorder %v3465_v45, %v911_v42 }
 0x2a3   : > { %2210 = vmatmul.mubr.msk.f32.gmra.mxu1 %vm1163_vm4, %v2324_v13  ;;  %v1092_v4 = vshll.u32 %v1091_v12, 16 }
 0x2a4   : > { %v939_v41 = vadd.s32 %v938_v44, %v936_v16  ;;  %v925_v48 = vadd.s32 %v924_v39, %v922_v18  ;;  %2212 = vmatprep.mubr.msk.f32.mxu1 %vm1164_vm5, %v2324_v13 }
 0x2a5   : > { %v963_v46 = vpop.xlane.xlu0 %962  ;;  %v949_v59 = vpop.xlane.xlu1 %948 }
 0x2a6   : > { %v964_v15 = vcvt.f32.s32 %v963_v46  ;;  %v950_v62 = vcvt.f32.s32 %v949_v59  ;;  %vm1165_vm6 = vcmp.eq.s32.totalorder %v3465_v45, %v925_v48  ;;  %vm1166_vm7 = vcmp.eq.s32.totalorder %v3465_v45, %v939_v41 }
 0x2a7   : > { %2213 = vmatmul.mubr.msk.f32.gmra.mxu1 %vm1165_vm6, %v2324_v13 }
 0x2a8   : > { %v967_v35 = vadd.s32 %v966_v47, %v964_v15  ;;  %v953_v29 = vadd.s32 %v952_v57, %v950_v62  ;;  %2215 = vmatprep.mubr.msk.f32.mxu1 %vm1166_vm7, %v2324_v13  ;;  %v1134_v57 = vshll.u32 %v1133_v63, 16  ;;  %v2286_v63 = vld [vmem:[%s2378_s26 + $0x18] sm:$0xff] }
 0x2a9   : > { %v991_v36 = vpop.xlane.xlu0 %990  ;;  %v977_v19 = vpop.xlane.xlu1 %976 }
 0x2aa   : > { %v992_v22 = vcvt.f32.s32 %v991_v36  ;;  %v978_v61 = vcvt.f32.s32 %v977_v19  ;;  %vm1167_vm8 = vcmp.eq.s32.totalorder %v3465_v45, %v953_v29  ;;  %vm1168_vm9 = vcmp.eq.s32.totalorder %v3465_v45, %v967_v35 }
 0x2ab   : > { %2216 = vmatmul.mubr.msk.f32.gmra.mxu1 %vm1167_vm8, %v2324_v13  ;;  %v1148_v29 = vshll.u32 %v1147_v9, 16  ;;  %v3129_v36 = vstv %s2025_s16  ;;  %v2287_v9 = vld [vmem:[%s2378_s26 + $0x10] sm:$0xff] }
 0x2ac   : > { %v995_v50 = vadd.s32 %v994_v10, %v992_v22  ;;  %v981_v6 = vadd.s32 %v980_v32, %v978_v61  ;;  %2218 = vmatprep.mubr.msk.f32.mxu1 %vm1168_vm9, %v2324_v13  ;;  %v3466_v32 = vlaneseq }
 0x2ad   : > { %v1019_v54 = vpop.xlane.xlu0 %1018  ;;  %v1005_v3 = vpop.xlane.xlu1 %1004 }
 0x2ae   : > { %v1020_v31 = vcvt.f32.s32 %v1019_v54  ;;  %v1006_v33 = vcvt.f32.s32 %v1005_v3  ;;  %vm1169_vm10 = vcmp.eq.s32.totalorder %v3465_v45, %v981_v6  ;;  %vm1170_vm11 = vcmp.eq.s32.totalorder %v3465_v45, %v995_v50 }
 0x2af   : > { %2219 = vmatmul.mubr.msk.f32.gmra.mxu1 %vm1169_vm10, %v2324_v13  ;;  %v3125_v25 = vshrl.u32 %v3466_v32, 7 }
 0x2b0   : > { %v1023_v8 = vadd.s32 %v1022_v23, %v1020_v31  ;;  %v1009_v60 = vadd.s32 %v1008_v51, %v1006_v33  ;;  %2221 = vmatprep.mubr.msk.f32.mxu1 %vm1170_vm11, %v2324_v13 }
 0x2b1   : > { %v1047_v49 = vpop.xlane.xlu0 %1046  ;;  %v1033_v28 = vpop.xlane.xlu1 %1032  ;;  %v1522_v26 = vadd.s32 8, %v3125_v25  ;;  %v1524_v19 = vadd.s32 24, %v3125_v25  ;;  %v1523_v22 = vadd.s32 16, %v3125_v25  ;;  %v1526_v50 = vadd.s32 40, %v3125_v25 }
 0x2b2   : > { %v1048_v14 = vcvt.f32.s32 %v1047_v49  ;;  %v1034_v1 = vcvt.f32.s32 %v1033_v28  ;;  %vm1171_vm12 = vcmp.eq.s32.totalorder %v3465_v45, %v1009_v60  ;;  %vm1172_vm13 = vcmp.eq.s32.totalorder %v3465_v45, %v1023_v8  ;;  %v2284_v28 = vld [vmem:[%s2378_s26 + $0x8] sm:$0xff] }
 0x2b3   : > { %2222 = vmatmul.mubr.msk.f32.gmra.mxu1 %vm1171_vm12, %v2324_v13  ;;  %v1555_v61 = vadd.s32 %v3129_v36, %v1522_v26  ;;  %v1525_v6 = vadd.s32 32, %v3125_v25  ;;  %v1557_v23 = vadd.s32 %v3129_v36, %v1524_v19  ;;  %v1556_v51 = vadd.s32 %v3129_v36, %v1523_v22 }
 0x2b4   : > { %v1051_v17 = vadd.s32 %v1050_v55, %v1048_v14  ;;  %v1037_v40 = vadd.s32 %v1036_v24, %v1034_v1  ;;  %2224 = vmatprep.mubr.msk.f32.mxu1 %vm1172_vm13, %v2324_v13  ;;  %v1528_v2 = vadd.s32 56, %v3125_v25  ;;  %v1527_v43 = vadd.s32 48, %v3125_v25 }
 0x2b5   : > { %v1075_v5 = vpop.xlane.xlu0 %1074  ;;  %v1061_v42 = vpop.xlane.xlu1 %1060  ;;  %vm1587_vm8 = vcmp.lt.s32.totalorder %v1555_v61, 512  ;;  %v1559_v54 = vadd.s32 %v3129_v36, %v1526_v50  ;;  %v1530_v3 = vadd.s32 72, %v3125_v25  ;;  %v1558_v31 = vadd.s32 %v3129_v36, %v1525_v6  ;;  %v2289_v6 = vld [vmem:[%s2378_s26 + $0x20] sm:$0xff] }
 0x2b6   : > { %v1076_v34 = vcvt.f32.s32 %v1075_v5  ;;  %v1062_v44 = vcvt.f32.s32 %v1061_v42  ;;  %vm1173_vm14 = vcmp.eq.s32.totalorder %v3465_v45, %v1037_v40  ;;  %vm1174_vm15 = vcmp.eq.s32.totalorder %v3465_v45, %v1051_v17  ;;  %v2285_v5 = vld [vmem:[%s2378_s26] sm:$0xff] }
 0x2b7   : > { %2225 = vmatmul.mubr.msk.f32.gmra.mxu1 %vm1173_vm14, %v2324_v13  ;;  %v1529_v33 = vadd.s32 64, %v3125_v25  ;;  %vm1589_vm10 = vcmp.lt.s32.totalorder %v1557_v23, 512  ;;  %vm1588_vm11 = vcmp.lt.s32.totalorder %v1556_v51, 512  ;;  %v1561_v8 = vadd.s32 %v3129_v36, %v1528_v2 }
 0x2b8   : > { %v1079_v39 = vadd.s32 %v1078_v27, %v1076_v34  ;;  %v1065_v11 = vadd.s32 %v1064_v30, %v1062_v44  ;;  %2227 = vmatprep.mubr.msk.f32.mxu1 %vm1174_vm15, %v2324_v13  ;;  %v1560_v60 = vadd.s32 %v3129_v36, %v1527_v43  ;;  %v2325_v24 = vmov 0.0  }
 0x2b9   : > { %v1103_v52 = vpop.xlane.xlu0 %1102  ;;  %v1089_v16 = vpop.xlane.xlu1 %1088  ;;  %v2027_v0 = vsel %vm1587_vm8, 1.0, %v2325_v24  ;;  %v1532_v7 = vadd.s32 88, %v3125_v25  ;;  %v1531_v49 = vadd.s32 80, %v3125_v25  ;;  %vm1591_vm12 = vcmp.lt.s32.totalorder %v1559_v54, 512 }
 0x2ba   : > { %v1104_v18 = vcvt.f32.s32 %v1103_v52  ;;  %v1090_v41 = vcvt.f32.s32 %v1089_v16  ;;  %vm1175_vm0 = vcmp.eq.s32.totalorder %v3465_v45, %v1065_v11  ;;  %vm1176_vm2 = vcmp.eq.s32.totalorder %v3465_v45, %v1079_v39 }
 0x2bb   : > { %2228 = vmatmul.mubr.msk.f32.gmra.mxu1 %vm1175_vm0, %v2324_v13  ;;  %v1563_v17 = vadd.s32 %v3129_v36, %v1530_v3  ;;  %v2029_v27 = vsel %vm1589_vm10, 1.0, %v2325_v24  ;;  %v2028_v30 = vsel %vm1588_vm11, 1.0, %v2325_v24  ;;  %vm1590_vm13 = vcmp.lt.s32.totalorder %v1558_v31, 512 }
 0x2bc   : > { %v1107_v48 = vadd.s32 %v1106_v58, %v1104_v18  ;;  %v1093_v47 = vadd.s32 %v1092_v4, %v1090_v41  ;;  %2230 = vmatprep.mubr.msk.f32.mxu1 %vm1176_vm2, %v2324_v13  ;;  %v1562_v20 = vadd.s32 %v3129_v36, %v1529_v33  ;;  %vm1593_vm14 = vcmp.lt.s32.totalorder %v1561_v8, 512  ;;  %v2290_v33 = vld [vmem:[%s2378_s26 + $0x38] sm:$0xff] }
 0x2bd   : > { %v1131_v56 = vpop.xlane.xlu0 %1130  ;;  %v1117_v53 = vpop.xlane.xlu1 %1116  ;;  %vm1592_vm15 = vcmp.lt.s32.totalorder %v1560_v60, 512  ;;  %v2031_v44 = vsel %vm1591_vm12, 1.0, %v2325_v24  ;;  %v1565_v39 = vadd.s32 %v3129_v36, %v1532_v7  ;;  %v1564_v11 = vadd.s32 %v3129_v36, %v1531_v49 }
 0x2be   : > { %v1132_v46 = vcvt.f32.s32 %v1131_v56  ;;  %v1118_v59 = vcvt.f32.s32 %v1117_v53  ;;  %vm1177_vm3 = vcmp.eq.s32.totalorder %v3465_v45, %v1093_v47  ;;  %vm1178_vm4 = vcmp.eq.s32.totalorder %v3465_v45, %v1107_v48 }
 0x2bf   : > { %2231 = vmatmul.mubr.msk.f32.gmra.mxu1 %vm1177_vm3, %v2324_v13  ;;  %v1534_v58 = vadd.s32 104, %v3125_v25  ;;  %vm1595_vm0 = vcmp.lt.s32.totalorder %v1563_v17, 512  ;;  %v1533_v52 = vadd.s32 96, %v3125_v25  ;;  %v2030_v18 = vsel %vm1590_vm13, 1.0, %v2325_v24  ;;  %v2291_v17 = vld [vmem:[%s2378_s26 + $0x30] sm:$0xff] }
 0x2c0   : > { %v1135_v15 = vadd.s32 %v1134_v57, %v1132_v46  ;;  %v1121_v62 = vadd.s32 %v1120_v37, %v1118_v59  ;;  %2233 = vmatprep.mubr.msk.f32.mxu1 %vm1178_vm4, %v2324_v13  ;;  %v3182_v41 = vsel %vm1593_vm14, 1.0, %v2325_v24  ;;  %v3185_v48 = vsel %vm1592_vm15, 1.0, %v2325_v24 }
 0x2c1   : > { %v1145_v35 = vpop.xlane.xlu1 %1144  ;;  %vm1594_vm2 = vcmp.lt.s32.totalorder %v1562_v20, 512  ;;  %v3191_v46 = vsel %vm1595_vm0, 1.0, %v2325_v24  ;;  %vm1597_vm3 = vcmp.lt.s32.totalorder %v1565_v39, 512  ;;  %vm1596_vm4 = vcmp.lt.s32.totalorder %v1564_v11, 512 }
 0x2c2   : > { %v1146_v10 = vcvt.f32.s32 %v1145_v35  ;;  %vm1179_vm5 = vcmp.eq.s32.totalorder %v3465_v45, %v1121_v62  ;;  %vm1180_vm6 = vcmp.eq.s32.totalorder %v3465_v45, %v1135_v15  ;;  %v1567_v59 = vadd.s32 %v3129_v36, %v1534_v58  ;;  %v2288_v35 = vld [vmem:[%s2378_s26 + $0x28] sm:$0xff] }
 0x2c3   : > { %2234 = vmatmul.mubr.msk.f32.gmra.mxu1 %vm1179_vm5, %v2324_v13  ;;  %v3201_v26 = vsel %vm1594_vm2, 1.0, %v2325_v24  ;;  %v1536_v19 = vadd.s32 120, %v3125_v25  ;;  %v1535_v22 = vadd.s32 112, %v3125_v25  ;;  %v3211_v43 = vsel %vm1597_vm3, 1.0, %v2325_v24 }
 0x2c4   : > { %v1149_v38 = vadd.s32 %v1148_v29, %v1146_v10  ;;  %2236 = vmatprep.mubr.msk.f32.mxu1 %vm1180_vm6, %v2324_v13  ;;  %v1566_v10 = vadd.s32 %v3129_v36, %v1533_v52  ;;  %v3215_v54 = vsel %vm1596_vm4, 1.0, %v2325_v24  ;;  %vm1599_vm5 = vcmp.lt.s32.totalorder %v1567_v59, 512 }
 0x2c5   : > { %v1569_v7 = vadd.s32 %v3129_v36, %v1536_v19  ;;  %v1568_v49 = vadd.s32 %v3129_v36, %v1535_v22  ;;  %v3229_v20 = vsel %vm1599_vm5, 1.0, %v2325_v24 }
 0x2c6   : > { %vm1181_vm7 = vcmp.eq.s32.totalorder %v3465_v45, %v1149_v38  ;;  %vm1598_vm6 = vcmp.lt.s32.totalorder %v1566_v10, 512 }
 0x2c7   : > { %2237 = vmatmul.mubr.msk.f32.gmra.mxu1 %vm1181_vm7, %v2324_v13  ;;  %v1554_v13 = vadd.s32 %v3129_v36, %v3125_v25  ;;  %v3239_v11 = vsel %vm1598_vm6, 1.0, %v2325_v24  ;;  %vm1601_vm7 = vcmp.lt.s32.totalorder %v1569_v7, 512  ;;  %vm1600_vm8 = vcmp.lt.s32.totalorder %v1568_v49, 512 }
 0x2c9   : > { %vm1586_vm9 = vcmp.lt.s32.totalorder %v1554_v13, 512 }
 0x2ca   : > { %v2026_v1 = vsel %vm1586_vm9, 1.0, %v2325_v24 }
 0x34b   : > { %v2193_v55 = vpop.f32.mrf.mxu0 }
 0x34c   : > { %1488 = vst.msk [vmem:[%s3149_s21 + $0x8] sm:$0xff] %vm287_vm1, %v2193_v55  ;;  %v1683_v14 = vsub.f32 %v2193_v55, %v2284_v28 }
 0x34d   : > { %v1328_v40 = vpop.f32.mrf.mxu0 }
 0x34e   : > { %v1715_v12 = vmul.f32 %v1683_v14, %v1683_v14  ;;  %1487 = vst.msk [vmem:[%s3149_s21] sm:$0xff] %vm287_vm1, %v1328_v40  ;;  %v1682_v42 = vsub.f32 %v1328_v40, %v2285_v5  ;;  %v1537_v5 = vadd.s32 128, %v3125_v25 }
 0x34f   : > { %v2196_v34 = vpop.f32.mrf.mxu0 }
 0x350   : > { %v1714_v4 = vmul.f32 %v1682_v42, %v1682_v42  ;;  %1490 = vst.msk [vmem:[%s3149_s21 + $0x18] sm:$0xff] %vm287_vm1, %v2196_v34  ;;  %v1685_v21 = vsub.f32 %v2196_v34, %v2286_v63  ;;  %v1747_v47 = vmul.f32 %v2027_v0, %v1715_v12  ;;  %v1538_v12 = vadd.s32 136, %v3125_v25 }
 0x351   : > { %v1338_v16 = vpop.f32.mrf.mxu0 }
 0x352   : > { %v1746_v57 = vmul.f32 %v2026_v1, %v1714_v4  ;;  %v1717_v37 = vmul.f32 %v1685_v21, %v1685_v21  ;;  %1489 = vst.msk [vmem:[%s3149_s21 + $0x10] sm:$0xff] %vm287_vm1, %v1338_v16  ;;  %v1684_v56 = vsub.f32 %v1338_v16, %v2287_v9  ;;  %v1779_v61 = vsel %vm287_vm1, %v1747_v47, 0.0 }
 0x353   : > { %v2199_v53 = vpop.f32.mrf.mxu0  ;;  %v1571_v9 = vadd.s32 %v3129_v36, %v1538_v12 }
 0x354   : > { %v1778_v15 = vsel %vm287_vm1, %v1746_v57, 0.0  ;;  %v1716_v62 = vmul.f32 %v1684_v56, %v1684_v56  ;;  %1492 = vst.msk [vmem:[%s3149_s21 + $0x28] sm:$0xff] %vm287_vm1, %v2199_v53  ;;  %v1687_v29 = vsub.f32 %v2199_v53, %v2288_v35  ;;  %v1749_v38 = vmul.f32 %v2029_v27, %v1717_v37 }
 0x355   : > { %v1348_v32 = vpop.f32.mrf.mxu0  ;;  %v1780_v51 = vadd.f32 %v1779_v61, %v1778_v15  ;;  %v1540_v56 = vadd.s32 152, %v3125_v25  ;;  %vm1603_vm9 = vcmp.lt.s32.totalorder %v1571_v9, 512  ;;  %v1543_v9 = vadd.s32 176, %v3125_v25 }
 0x356   : > { %v1748_v50 = vmul.f32 %v2028_v30, %v1716_v62  ;;  %v1719_v13 = vmul.f32 %v1687_v29, %v1687_v29  ;;  %1491 = vst.msk [vmem:[%s3149_s21 + $0x20] sm:$0xff] %vm287_vm1, %v1348_v32  ;;  %v1686_v23 = vsub.f32 %v1348_v32, %v2289_v6  ;;  %v1783_v60 = vsel %vm287_vm1, %v1749_v38, 0.0 }
 0x357   : > { %v2202_v2 = vpop.f32.mrf.mxu1  ;;  %v1539_v62 = vadd.s32 144, %v3125_v25  ;;  %v3258_v38 = vsel %vm1601_vm7, 1.0, %v2325_v24  ;;  %v3262_v32 = vsel %vm1600_vm8, 1.0, %v2325_v24 }
 0x358   : > { %v1781_v3 = vsel %vm287_vm1, %v1748_v50, 0.0  ;;  %v1718_v31 = vmul.f32 %v1686_v23, %v1686_v23  ;;  %1494 = vst.msk [vmem:[%s3149_s21 + $0x38] sm:$0xff] %vm287_vm1, %v2202_v2  ;;  %v1689_v8 = vsub.f32 %v2202_v2, %v2290_v33  ;;  %v1751_v28 = vmul.f32 %v2031_v44, %v1719_v13  ;;  %v2292_v44 = vld [vmem:[%s2378_s26 + $0x48] sm:$0xff]  ;;  %v2295_v50 = vld [vmem:[%s2378_s26 + $0x50] sm:$0xff] }
 0x359   : > { %v1782_v55 = vadd.f32 %v1781_v3, %v1780_v51  ;;  %v1358_v0 = vpop.f32.mrf.mxu1  ;;  %v1573_v51 = vadd.s32 %v3129_v36, %v1540_v56 }
 0x35a   : > { %v1750_v14 = vmul.f32 %v2030_v18, %v1718_v31  ;;  %v1721_v1 = vmul.f32 %v1689_v8, %v1689_v8  ;;  %1493 = vst.msk [vmem:[%s3149_s21 + $0x30] sm:$0xff] %vm287_vm1, %v1358_v0  ;;  %v1688_v40 = vsub.f32 %v1358_v0, %v2291_v17  ;;  %v1787_v21 = vsel %vm287_vm1, %v1751_v28, 0.0  ;;  %v2293_v18 = vld [vmem:[%s2378_s26 + $0x40] sm:$0xff] }
 0x35b   : > { %v1784_v27 = vadd.f32 %v1783_v60, %v1782_v55  ;;  %v2205_v30 = vpop.f32.mrf.mxu1  ;;  %v1572_v31 = vadd.s32 %v3129_v36, %v1539_v62  ;;  %v1542_v55 = vadd.s32 168, %v3125_v25  ;;  %v1541_v0 = vadd.s32 160, %v3125_v25 }
 0x35c   : > { %v1785_v42 = vsel %vm287_vm1, %v1750_v14, 0.0  ;;  %v1720_v34 = vmul.f32 %v1688_v40, %v1688_v40  ;;  %1496 = vst.msk [vmem:[%s3149_s21 + $0x48] sm:$0xff] %vm287_vm1, %v2205_v30  ;;  %v1691_v39 = vsub.f32 %v2205_v30, %v2292_v44  ;;  %v1753_v4 = vmul.f32 %v3182_v41, %v1721_v1  ;;  %v2297_v14 = vld [vmem:[%s2378_s26 + $0x60] sm:$0xff] }
 0x35d   : > { %v1786_v58 = vadd.f32 %v1785_v42, %v1784_v27  ;;  %v1368_v63 = vpop.f32.mrf.mxu1  ;;  %v1570_v41 = vadd.s32 %v3129_v36, %v1537_v5  ;;  %vm1605_vm11 = vcmp.lt.s32.totalorder %v1573_v51, 512  ;;  %vm1604_vm12 = vcmp.lt.s32.totalorder %v1572_v31, 512 }
 0x35e   : > { %v1752_v52 = vmul.f32 %v3185_v48, %v1720_v34  ;;  %v1723_v16 = vmul.f32 %v1691_v39, %v1691_v39  ;;  %1495 = vst.msk [vmem:[%s3149_s21 + $0x40] sm:$0xff] %vm287_vm1, %v1368_v63  ;;  %v1690_v47 = vsub.f32 %v1368_v63, %v2293_v18  ;;  %v2294_v48 = vld [vmem:[%s2378_s26 + $0x58] sm:$0xff]  ;;  %v1791_v35 = vsel %vm287_vm1, %v1753_v4, 0.0 }
 0x35f   : > { %v1788_v57 = vadd.f32 %v1787_v21, %v1786_v58  ;;  %v2208_v37 = vpop.f32.mrf.mxu1  ;;  %vm1602_vm10 = vcmp.lt.s32.totalorder %v1570_v41, 512  ;;  %v1575_v39 = vadd.s32 %v3129_v36, %v1542_v55  ;;  %v1574_v58 = vadd.s32 %v3129_v36, %v1541_v0  ;;  %v2303_v0 = vld [vmem:[%s2378_s26 + $0x90] sm:$0xff] }
 0x360   : > { %v1789_v53 = vsel %vm287_vm1, %v1752_v52, 0.0  ;;  %v1722_v59 = vmul.f32 %v1690_v47, %v1690_v47  ;;  %1498 = vst.msk [vmem:[%s3149_s21 + $0x58] sm:$0xff] %vm287_vm1, %v2208_v37  ;;  %v1693_v15 = vsub.f32 %v2208_v37, %v2294_v48  ;;  %v1755_v19 = vmul.f32 %v3191_v46, %v1723_v16  ;;  %v2296_v46 = vld [vmem:[%s2378_s26 + $0x68] sm:$0xff]  ;;  %v2299_v52 = vld [vmem:[%s2378_s26 + $0x70] sm:$0xff] }
 0x361   : > { %v1790_v29 = vadd.f32 %v1789_v53, %v1788_v57  ;;  %v1378_v10 = vpop.f32.mrf.mxu1  ;;  %v2042_v27 = vsel %vm1602_vm10, 1.0, %v2325_v24  ;;  %v2045_v57 = vsel %vm1605_vm11, 1.0, %v2325_v24  ;;  %v1544_v37 = vadd.s32 184, %v3125_v25 }
 0x362   : > { %v1754_v22 = vmul.f32 %v3201_v26, %v1722_v59  ;;  %v1725_v61 = vmul.f32 %v1693_v15, %v1693_v15  ;;  %1497 = vst.msk [vmem:[%s3149_s21 + $0x50] sm:$0xff] %vm287_vm1, %v1378_v10  ;;  %v1692_v13 = vsub.f32 %v1378_v10, %v2295_v50  ;;  %v1795_v7 = vsel %vm287_vm1, %v1755_v19, 0.0  ;;  %v2301_v10 = vld [vmem:[%s2378_s26 + $0x80] sm:$0xff] }
 0x363   : > { %v1792_v6 = vadd.f32 %v1791_v35, %v1790_v29  ;;  %v2211_v23 = vpop.f32.mrf.mxu1  ;;  %v2044_v53 = vsel %vm1604_vm12, 1.0, %v2325_v24  ;;  %vm1607_vm13 = vcmp.lt.s32.totalorder %v1575_v39, 512  ;;  %vm1606_vm14 = vcmp.lt.s32.totalorder %v1574_v58, 512  ;;  %v2305_v58 = vld [vmem:[%s2378_s26 + $0xa0] sm:$0xff] }
 0x364   : > { %v1793_v2 = vsel %vm287_vm1, %v1754_v22, 0.0  ;;  %v1724_v3 = vmul.f32 %v1692_v13, %v1692_v13  ;;  %1500 = vst.msk [vmem:[%s3149_s21 + $0x68] sm:$0xff] %vm287_vm1, %v2211_v23  ;;  %v1695_v26 = vsub.f32 %v2211_v23, %v2296_v46  ;;  %v1757_v8 = vmul.f32 %v3211_v43, %v1725_v61 }
 0x365   : > { %v1794_v33 = vadd.f32 %v1793_v2, %v1792_v6  ;;  %v1388_v60 = vpop.f32.mrf.mxu1  ;;  %v2043_v43 = vsel %vm1603_vm9, 1.0, %v2325_v24  ;;  %v1577_v50 = vadd.s32 %v3129_v36, %v1544_v37  ;;  %v1546_v13 = vadd.s32 200, %v3125_v25 }
 0x366   : > { %v1756_v49 = vmul.f32 %v3215_v54, %v1724_v3  ;;  %v1727_v28 = vmul.f32 %v1695_v26, %v1695_v26  ;;  %1499 = vst.msk [vmem:[%s3149_s21 + $0x60] sm:$0xff] %vm287_vm1, %v1388_v60  ;;  %v1694_v1 = vsub.f32 %v1388_v60, %v2297_v14  ;;  %v2298_v54 = vld [vmem:[%s2378_s26 + $0x78] sm:$0xff]  ;;  %v1799_v42 = vsel %vm287_vm1, %v1757_v8, 0.0 }
 0x367   : > { %v1796_v17 = vadd.f32 %v1795_v7, %v1794_v33  ;;  %v2214_v40 = vpop.f32.mrf.mxu1  ;;  %v1545_v2 = vadd.s32 192, %v3125_v25  ;;  %v2047_v31 = vsel %vm1607_vm13, 1.0, %v2325_v24  ;;  %v2046_v33 = vsel %vm1606_vm14, 1.0, %v2325_v24 }
 0x368   : > { %v1797_v30 = vsel %vm287_vm1, %v1756_v49, 0.0  ;;  %v1726_v12 = vmul.f32 %v1694_v1, %v1694_v1  ;;  %1502 = vst.msk [vmem:[%s3149_s21 + $0x78] sm:$0xff] %vm287_vm1, %v2214_v40  ;;  %v1697_v5 = vsub.f32 %v2214_v40, %v2298_v54  ;;  %v1759_v4 = vmul.f32 %v3229_v20, %v1727_v28  ;;  %v2304_v40 = vld [vmem:[%s2378_s26 + $0xa8] sm:$0xff] }
 0x369   : > { %v1798_v34 = vadd.f32 %v1797_v30, %v1796_v17  ;;  %v1398_v44 = vpop.f32.mrf.mxu1  ;;  %vm1609_vm15 = vcmp.lt.s32.totalorder %v1577_v50, 512  ;;  %v1579_v14 = vadd.s32 %v3129_v36, %v1546_v13  ;;  %vm1850_vm10 = vcmp.eq.s32.totalorder %v3465_v45, 0 }
 0x36a   : > { %v1758_v63 = vmul.f32 %v3239_v11, %v1726_v12  ;;  %v1729_v21 = vmul.f32 %v1697_v5, %v1697_v5  ;;  %1501 = vst.msk [vmem:[%s3149_s21 + $0x70] sm:$0xff] %vm287_vm1, %v1398_v44  ;;  %v1696_v16 = vsub.f32 %v1398_v44, %v2299_v52  ;;  %v2300_v11 = vld [vmem:[%s2378_s26 + $0x88] sm:$0xff]  ;;  %v1803_v62 = vsel %vm287_vm1, %v1759_v4, 0.0 }
 0x36b   : > { %v1800_v18 = vadd.f32 %v1799_v42, %v1798_v34  ;;  %v2217_v47 = vpop.f32.mrf.mxu1  ;;  %v1548_v5 = vadd.s32 216, %v3125_v25  ;;  %v1547_v42 = vadd.s32 208, %v3125_v25  ;;  %v2049_v52 = vsel %vm1609_vm15, 1.0, %v2325_v24 }
 0x36c   : > { %v1801_v20 = vsel %vm287_vm1, %v1758_v63, 0.0  ;;  %v1728_v41 = vmul.f32 %v1696_v16, %v1696_v16  ;;  %1504 = vst.msk [vmem:[%s3149_s21 + $0x88] sm:$0xff] %vm287_vm1, %v2217_v47  ;;  %v1699_v56 = vsub.f32 %v2217_v47, %v2300_v11  ;;  %v1761_v48 = vmul.f32 %v3258_v38, %v1729_v21 }
 0x36d   : > { %v1802_v59 = vadd.f32 %v1801_v20, %v1800_v18  ;;  %v1408_v15 = vpop.f32.mrf.mxu1  ;;  %v1576_v38 = vadd.s32 %v3129_v36, %v1543_v9  ;;  %vm1611_vm2 = vcmp.lt.s32.totalorder %v1579_v14, 512  ;;  %v1581_v11 = vadd.s32 %v3129_v36, %v1548_v5 }
 0x36e   : > { %v1760_v35 = vmul.f32 %v3262_v32, %v1728_v41  ;;  %v1731_v29 = vmul.f32 %v1699_v56, %v1699_v56  ;;  %1503 = vst.msk [vmem:[%s3149_s21 + $0x80] sm:$0xff] %vm287_vm1, %v1408_v15  ;;  %v1698_v19 = vsub.f32 %v1408_v15, %v2301_v10  ;;  %v2302_v32 = vld [vmem:[%s2378_s26 + $0x98] sm:$0xff]  ;;  %v1807_v3 = vsel %vm287_vm1, %v1761_v48, 0.0  ;;  %v2307_v15 = vld [vmem:[%s2378_s26 + $0xb0] sm:$0xff] }
 0x36f   : > { %v1804_v22 = vadd.f32 %v1803_v62, %v1802_v59  ;;  %v2220_v61 = vpop.f32.mrf.mxu1  ;;  %vm1608_vm0 = vcmp.lt.s32.totalorder %v1576_v38, 512  ;;  %v1580_v56 = vadd.s32 %v3129_v36, %v1547_v42  ;;  %v2051_v10 = vsel %vm1611_vm2, 1.0, %v2325_v24  ;;  %v2308_v38 = vld [vmem:[%s2378_s26 + $0xc8] sm:$0xff]  ;;  %v2311_v42 = vld [vmem:[%s2378_s26 + $0xd0] sm:$0xff] }
 0x370   : > { %v1805_v6 = vsel %vm287_vm1, %v1760_v35, 0.0  ;;  %v1730_v23 = vmul.f32 %v1698_v19, %v1698_v19  ;;  %1506 = vst.msk [vmem:[%s3149_s21 + $0x98] sm:$0xff] %vm287_vm1, %v2220_v61  ;;  %v1701_v51 = vsub.f32 %v2220_v61, %v2302_v32  ;;  %v1763_v8 = vmul.f32 %v2043_v43, %v1731_v29 }
 0x371   : > { %v1806_v46 = vadd.f32 %v1805_v6, %v1804_v22  ;;  %v1418_v26 = vpop.f32.mrf.mxu1  ;;  %v2048_v16 = vsel %vm1608_vm0, 1.0, %v2325_v24  ;;  %v1550_v19 = vadd.s32 232, %v3125_v25  ;;  %v1549_v22 = vadd.s32 224, %v3125_v25 }
 0x372   : > { %v1762_v60 = vmul.f32 %v2042_v27, %v1730_v23  ;;  %v1733_v55 = vmul.f32 %v1701_v51, %v1701_v51  ;;  %1505 = vst.msk [vmem:[%s3149_s21 + $0x90] sm:$0xff] %vm287_vm1, %v1418_v26  ;;  %v1700_v7 = vsub.f32 %v1418_v26, %v2303_v0  ;;  %v1578_v27 = vadd.s32 %v3129_v36, %v1545_v2  ;;  %v2309_v26 = vld [vmem:[%s2378_s26 + $0xc0] sm:$0xff] }
 0x373   : > { %v1808_v49 = vadd.f32 %v1807_v3, %v1806_v46  ;;  %v2223_v28 = vpop.f32.mrf.mxu1  ;;  %v1811_v34 = vsel %vm287_vm1, %v1763_v8, 0.0  ;;  %vm1613_vm4 = vcmp.lt.s32.totalorder %v1581_v11, 512  ;;  %vm1612_vm5 = vcmp.lt.s32.totalorder %v1580_v56, 512 }
 0x374   : > { %v1809_v1 = vsel %vm287_vm1, %v1762_v60, 0.0  ;;  %v1732_v17 = vmul.f32 %v1700_v7, %v1700_v7  ;;  %1508 = vst.msk [vmem:[%s3149_s21 + $0xa8] sm:$0xff] %vm287_vm1, %v2223_v28  ;;  %v1703_v43 = vsub.f32 %v2223_v28, %v2304_v40  ;;  %v1765_v12 = vmul.f32 %v2045_v57, %v1733_v55  ;;  %v2306_v57 = vld [vmem:[%s2378_s26 + $0xb8] sm:$0xff] }
 0x375   : > { %v1810_v30 = vadd.f32 %v1809_v1, %v1808_v49  ;;  %v1428_v54 = vpop.f32.mrf.mxu1  ;;  %vm1610_vm3 = vcmp.lt.s32.totalorder %v1578_v27, 512  ;;  %v1583_v60 = vadd.s32 %v3129_v36, %v1550_v19  ;;  %v1582_v55 = vadd.s32 %v3129_v36, %v1549_v22  ;;  %v2310_v28 = vld [vmem:[%s2378_s26 + $0xd8] sm:$0xff] }
 0x376   : > { %v1764_v44 = vmul.f32 %v2044_v53, %v1732_v17  ;;  %v1735_v39 = vmul.f32 %v1703_v43, %v1703_v43  ;;  %1507 = vst.msk [vmem:[%s3149_s21 + $0xa0] sm:$0xff] %vm287_vm1, %v1428_v54  ;;  %v1702_v4 = vsub.f32 %v1428_v54, %v2305_v58  ;;  %v1815_v9 = vsel %vm287_vm1, %v1765_v12, 0.0 }
 0x377   : > { %v1812_v63 = vadd.f32 %v1811_v34, %v1810_v30  ;;  %v2226_v21 = vpop.f32.mrf.mxu1  ;;  %v2050_v6 = vsel %vm1610_vm3, 1.0, %v2325_v24  ;;  %v1552_v0 = vadd.s32 248, %v3125_v25  ;;  %v1551_v1 = vadd.s32 240, %v3125_v25 }
 0x378   : > { %v1813_v18 = vsel %vm287_vm1, %v1764_v44, 0.0  ;;  %v1734_v47 = vmul.f32 %v1702_v4, %v1702_v4  ;;  %1510 = vst.msk [vmem:[%s3149_s21 + $0xb8] sm:$0xff] %vm287_vm1, %v2226_v21  ;;  %v1705_v37 = vsub.f32 %v2226_v21, %v2306_v57  ;;  %v1767_v53 = vmul.f32 %v2047_v31, %v1735_v39 }
 0x379   : > { %v1814_v20 = vadd.f32 %v1813_v18, %v1812_v63  ;;  %v1438_v41 = vpop.f32.mrf.mxu1  ;;  %v2053_v43 = vsel %vm1613_vm4, 1.0, %v2325_v24  ;;  %v2052_v30 = vsel %vm1612_vm5, 1.0, %v2325_v24  ;;  %vm1615_vm6 = vcmp.lt.s32.totalorder %v1583_v60, 512  ;;  %v2312_v63 = vld [vmem:[%s2378_s26 + $0xe8] sm:$0xff] }
 0x37a   : > { %v1766_v59 = vmul.f32 %v2046_v33, %v1734_v47  ;;  %v1737_v48 = vmul.f32 %v1705_v37, %v1705_v37  ;;  %1509 = vst.msk [vmem:[%s3149_s21 + $0xb0] sm:$0xff] %vm287_vm1, %v1438_v41  ;;  %v1704_v62 = vsub.f32 %v1438_v41, %v2307_v15  ;;  %v1819_v2 = vsel %vm287_vm1, %v1767_v53, 0.0  ;;  %v2314_v15 = vld [vmem:[%s2378_s26 + $0xf8] sm:$0xff] }
 0x37b   : > { %v1816_v35 = vadd.f32 %v1815_v9, %v1814_v20  ;;  %v2229_v29 = vpop.f32.mrf.mxu1  ;;  %vm1614_vm7 = vcmp.lt.s32.totalorder %v1582_v55, 512  ;;  %v1585_v39 = vadd.s32 %v3129_v36, %v1552_v0  ;;  %v2313_v20 = vld [vmem:[%s2378_s26 + $0xe0] sm:$0xff]  ;;  %v2055_v56 = vsel %vm1615_vm6, 1.0, %v2325_v24 }
 0x37c   : > { %v1817_v61 = vsel %vm287_vm1, %v1766_v59, 0.0  ;;  %v1736_v50 = vmul.f32 %v1704_v62, %v1704_v62  ;;  %1512 = vst.msk [vmem:[%s3149_s21 + $0xc8] sm:$0xff] %vm287_vm1, %v2229_v29  ;;  %v1707_v13 = vsub.f32 %v2229_v29, %v2308_v38  ;;  %v1769_v32 = vmul.f32 %v2049_v52, %v1737_v48 }
 0x37d   : > { %v1818_v23 = vadd.f32 %v1817_v61, %v1816_v35  ;;  %v1448_v51 = vpop.f32.mrf.mxu1  ;;  %v1584_v52 = vadd.s32 %v3129_v36, %v1551_v1  ;;  %v2054_v36 = vsel %vm1614_vm7, 1.0, %v2325_v24  ;;  %vm1617_vm8 = vcmp.lt.s32.totalorder %v1585_v39, 512 }
 0x37e   : > { %v1768_v3 = vmul.f32 %v2048_v16, %v1736_v50  ;;  %v1739_v46 = vmul.f32 %v1707_v13, %v1707_v13  ;;  %1511 = vst.msk [vmem:[%s3149_s21 + $0xc0] sm:$0xff] %vm287_vm1, %v1448_v51  ;;  %v1706_v31 = vsub.f32 %v1448_v51, %v2309_v26  ;;  %v1823_v17 = vsel %vm287_vm1, %v1769_v32, 0.0  ;;  %v2315_v50 = vld [vmem:[%s2378_s26 + $0xf0] sm:$0xff]  ;;  %s236_s26 = scalar_lea.vmem %s3430_s5, %s3470_s19 }
 0x37f   : > { %v1820_v33 = vadd.f32 %v1819_v2, %v1818_v23  ;;  %v2232_v8 = vpop.f32.mrf.mxu1  ;;  %vm1616_vm9 = vcmp.lt.s32.totalorder %v1584_v52, 512 }
 0x380   : > { %v1821_v7 = vsel %vm287_vm1, %v1768_v3, 0.0  ;;  %v1738_v49 = vmul.f32 %v1706_v31, %v1706_v31  ;;  %1514 = vst.msk [vmem:[%s3149_s21 + $0xd8] sm:$0xff] %vm287_vm1, %v2232_v8  ;;  %v1709_v14 = vsub.f32 %v2232_v8, %v2310_v28  ;;  %v1771_v12 = vmul.f32 %v2051_v10, %v1739_v46 }
 0x381   : > { %v1822_v40 = vadd.f32 %v1821_v7, %v1820_v33  ;;  %v1458_v27 = vpop.f32.mrf.mxu1  ;;  %v2056_v23 = vsel %vm1616_vm9, 1.0, %v2325_v24 }
 0x382   : > { %v1770_v54 = vmul.f32 %v2050_v6, %v1738_v49  ;;  %v1741_v5 = vmul.f32 %v1709_v14, %v1709_v14  ;;  %1513 = vst.msk [vmem:[%s3149_s21 + $0xd0] sm:$0xff] %vm287_vm1, %v1458_v27  ;;  %v1708_v34 = vsub.f32 %v1458_v27, %v2311_v42  ;;  %v1827_v57 = vsel %vm287_vm1, %v1771_v12, 0.0 }
 0x383   : > { %v1824_v25 = vadd.f32 %v1823_v17, %v1822_v40  ;;  %v2235_v44 = vpop.f32.mrf.mxu1  ;;  %v2057_v6 = vsel %vm1617_vm8, 1.0, %v2325_v24 }
 0x384   : > { %v1825_v58 = vsel %vm287_vm1, %v1770_v54, 0.0  ;;  %v1740_v4 = vmul.f32 %v1708_v34, %v1708_v34  ;;  %1516 = vst.msk [vmem:[%s3149_s21 + $0xe8] sm:$0xff] %vm287_vm1, %v2235_v44  ;;  %v1711_v21 = vsub.f32 %v2235_v44, %v2312_v63  ;;  %v1773_v18 = vmul.f32 %v2053_v43, %v1741_v5 }
 0x385   : > { %v1826_v16 = vadd.f32 %v1825_v58, %v1824_v25  ;;  %v1468_v47 = vpop.f32.mrf.mxu1 }
 0x386   : > { %v1772_v37 = vmul.f32 %v2052_v30, %v1740_v4  ;;  %v1743_v9 = vmul.f32 %v1711_v21, %v1711_v21  ;;  %1515 = vst.msk [vmem:[%s3149_s21 + $0xe0] sm:$0xff] %vm287_vm1, %v1468_v47  ;;  %v1710_v41 = vsub.f32 %v1468_v47, %v2313_v20  ;;  %v1831_v35 = vsel %vm287_vm1, %v1773_v18, 0.0 }
 0x387   : > { %v1828_v11 = vadd.f32 %v1827_v57, %v1826_v16  ;;  %v2238_v53 = vpop.f32.mrf.mxu1 }
 0x388   : > { %v1829_v59 = vsel %vm287_vm1, %v1772_v37, 0.0  ;;  %v1742_v48 = vmul.f32 %v1710_v41, %v1710_v41  ;;  %1518 = vst.msk [vmem:[%s3149_s21 + $0xf8] sm:$0xff] %vm287_vm1, %v2238_v53  ;;  %v1713_v62 = vsub.f32 %v2238_v53, %v2314_v15  ;;  %v1775_v19 = vmul.f32 %v2055_v56, %v1743_v9 }
 0x389   : > { %v1830_v29 = vadd.f32 %v1829_v59, %v1828_v11  ;;  %v1478_v10 = vpop.f32.mrf.mxu1 }
 0x38a   : > { %v1774_v22 = vmul.f32 %v2054_v36, %v1742_v48  ;;  %v1745_v61 = vmul.f32 %v1713_v62, %v1713_v62  ;;  %1517 = vst.msk [vmem:[%s3149_s21 + $0xf0] sm:$0xff] %vm287_vm1, %v1478_v10  ;;  %v1712_v38 = vsub.f32 %v1478_v10, %v2315_v50  ;;  %v1835_v3 = vsel %vm287_vm1, %v1775_v19, 0.0 }
 0x38b   : > { %v1832_v13 = vadd.f32 %v1831_v35, %v1830_v29 }
 0x38c   : > { %v1833_v32 = vsel %vm287_vm1, %v1774_v22, 0.0  ;;  %v1744_v51 = vmul.f32 %v1712_v38, %v1712_v38  ;;  %v1777_v46 = vmul.f32 %v2057_v6, %v1745_v61 }
 0x38d   : > { %v1834_v2 = vadd.f32 %v1833_v32, %v1832_v13 }
 0x38e   : > { %v1776_v26 = vmul.f32 %v2056_v23, %v1744_v51  ;;  %v1839_v60 = vsel %vm287_vm1, %v1777_v46, 0.0 }
 0x38f   : > { %v1836_v31 = vadd.f32 %v1835_v3, %v1834_v2 }
 0x390   : > { %v1837_v33 = vsel %vm287_vm1, %v1776_v26, 0.0 }
 0x391   : > { %v1838_v8 = vadd.f32 %v1837_v33, %v1836_v31 }
 0x393   : > { %v1840_v55 = vadd.f32 %v1839_v60, %v1838_v8 }
 0x395   : > { %1841 = vadd.xlane.f32.xlu0 %v1840_v55 }
 0x41e   : > { %v1842_v0 = vpop.xlane.xlu0 %1841 }
 0x41f   : > { %v1843_v24 = vrot.slane %v1842_v0, 4 }
 0x421   : > { %v1844_v7 = vadd.f32 %v1843_v24, %v1842_v0 }
 0x423   : > { %v1845_v49 = vrot.slane %v1844_v7, 2 }
 0x425   : > { %v1846_v28 = vadd.f32 %v1845_v49, %v1844_v7 }
 0x427   : > { %v1847_v14 = vrot.slane %v1846_v28, 1 }
 0x429   : > { %v1848_v1 = vadd.f32 %v1847_v14, %v1846_v28 }
 0x42b   : > { %2272 = vpush %v1848_v1 }
 0x45c   : > { %s2273_s24 = spop %2272 }
 0x45d   : > { %v1851_v17 = vstv %s2273_s24 }
 0x45e   : > { %v1852_v40 = vsel %vm1850_vm10, %v1851_v17, 0.0 }
 0x45f   : > { %1853 = vst [vmem:[%s236_s26] sm:$0x1] %v1852_v40 }
 0x460 PF: > { %s16_s18 = sadd.s32 1, %s2322_s18  }
 0x461   : > { %p13_p5 = scmp.ge.s32.totalorder %s16_s18, 4  }
 0x463   :  { %15 = sbr.rel (!%p13_p5) target bundleno = 1 (0x1), region = 78 }

</bundles_post_ra>
